<compile_context>
chip_gen: v6e
topology: v6e:2x2x1
jax: 0.10.0
libtpu: 0.0.40
codegen_flags: <defaults>
</compile_context>

<pallas_src>
import jax
import jax.numpy as jnp
from jax.experimental import pallas as pl
from jax.experimental.pallas import tpu as pltpu

# Module hyper-parameters (small, consistent with the forward pass).
LATENT_DIM = 32
IMAGE_SIZE = 16
CHANNELS = 4

D0 = LATENT_DIM                           # 32
D1 = LATENT_DIM * 5                       # 160
D2 = LATENT_DIM * 10                      # 320
D3 = LATENT_DIM * 20                      # 640
D4 = IMAGE_SIZE * IMAGE_SIZE * CHANNELS   # 1024

# Lane-padded hidden dims (multiples of 128). Zero padding is exact:
# zero activation columns hit zero weight rows, LeakyReLU(0) = 0.
D1P = 256
D2P = 384
PAD_DIMS = [(D0, D1P), (D1P, D2P), (D2P, D3), (D3, D4)]

LEAKY_SLOPE = 0.01  # torch.nn.LeakyReLU default negative_slope


def _round_up(n, m):
    return ((n + m - 1) // m) * m


def _cdiv(a, b):
    return -(-a // b)


def _leaky_relu(x):
    # Equivalent to where(x>=0, x, a*x) for 0 < a < 1; lowers to mul+max.
    return jnp.maximum(x, LEAKY_SLOPE * x)


def generator_kernel(x_ref,
                     w1_ref, b1_ref,
                     w2_ref, b2_ref,
                     w3_ref, b3_ref,
                     w4_ref, b4_ref,
                     out_ref):
    """Fused 4-layer MLP on one batch tile.

    Matmuls run bf16 x bf16 on the MXU with f32 accumulation; bias add,
    LeakyReLU and tanh stay in f32 on the VPU/EUP. Inter-layer activations
    are kept in bf16 and never leave VMEM between layers.
    """
    h = x_ref[...]  # already bf16 (pre-cast in the wrapper)

    z = jnp.dot(h, w1_ref[...], preferred_element_type=jnp.float32) + b1_ref[...]
    h = _leaky_relu(z).astype(jnp.bfloat16)

    z = jnp.dot(h, w2_ref[...], preferred_element_type=jnp.float32) + b2_ref[...]
    h = _leaky_relu(z).astype(jnp.bfloat16)

    z = jnp.dot(h, w3_ref[...], preferred_element_type=jnp.float32) + b3_ref[...]
    h = _leaky_relu(z).astype(jnp.bfloat16)

    z = jnp.dot(h, w4_ref[...], preferred_element_type=jnp.float32) + b4_ref[...]
    out_ref[...] = jnp.tanh(z).astype(out_ref.dtype)


def init_params(key):
    """PyTorch-Linear-like uniform fan-in init, f32, unpadded.

    Weights are (in_features, out_features) so the kernel computes x @ W,
    semantically identical to PyTorch's x @ W_t.T.
    """
    dims = [(D0, D1), (D1, D2), (D2, D3), (D3, D4)]
    params = []
    for (din, dout) in dims:
        key, kw, kb = jax.random.split(key, 3)
        bound = 1.0 / (din ** 0.5)
        w = jax.random.uniform(kw, (din, dout), jnp.float32, -bound, bound)
        b = jax.random.uniform(kb, (1, dout), jnp.float32, -bound, bound)
        params.append((w, b))
    return params


def pack_params(params_f32):
    """Zero-pad hidden dims to lane multiples; weights -> bf16, biases -> f32."""
    packed = []
    for (w, b), (dinp, doutp) in zip(params_f32, PAD_DIMS):
        din, dout = w.shape
        wp = jnp.zeros((dinp, doutp), jnp.float32).at[:din, :dout].set(w)
        bp = jnp.zeros((1, doutp), jnp.float32).at[:, :dout].set(b)
        packed.append((wp.astype(jnp.bfloat16), bp))
    return packed


def _batch_tiling(B, tb):
    """Sublane-aligned batch tile; >=2 grid steps whenever the batch allows it
    so the 'parallel' axis can shard across both v7x TensorCores."""
    B_al = _round_up(max(B, 1), 8)
    n_tiles = 1 if B_al < 16 else max(2, _cdiv(B_al, tb))
    tb_eff = _round_up(_cdiv(B_al, n_tiles), 8)
    return tb_eff, tb_eff * n_tiles, n_tiles


def generator_forward(x, packed_params, tb=512, out_dtype=jnp.bfloat16):
    """x: (B, LATENT_DIM) f32 -> (B, CHANNELS, IMAGE_SIZE, IMAGE_SIZE) out_dtype."""
    B = x.shape[0]
    (w1, b1), (w2, b2), (w3, b3), (w4, b4) = packed_params

    tb_eff, B_pad, n_tiles = _batch_tiling(B, tb)

    # Pre-cast the latent to bf16 (halves input DMA; exact MXU input layout).
    x = x.astype(jnp.bfloat16)
    if B_pad != B:
        x = jnp.pad(x, ((0, B_pad - B), (0, 0)))
    grid = (n_tiles,)

    row_map = lambda i: (i, 0)     # per-grid-step batch tile
    const_map = lambda i: (0, 0)   # weights/biases resident across steps

    out_itemsize = jnp.dtype(out_dtype).itemsize
    weight_bytes = sum(din * dout * 2 + dout * 4 for din, dout in PAD_DIMS)
    cost = pl.CostEstimate(
        flops=2 * B_pad * sum(din * dout for din, dout in PAD_DIMS),
        transcendentals=B_pad * D4,
        bytes_accessed=B_pad * D0 * 2 + B_pad * D4 * out_itemsize + weight_bytes,
    )

    # At tb<=512 with bf16 output/intermediates the footprint is well under
    # v5e's 16 MiB scoped default; only bump the limit for larger tiles.
    vmem_limit = (32 << 20) if tb_eff > 512 else None

    flat = pl.pallas_call(
        generator_kernel,
        out_shape=jax.ShapeDtypeStruct((B_pad, D4), out_dtype),
        grid=grid,
        in_specs=[
            pl.BlockSpec((tb_eff, D0), row_map),
            pl.BlockSpec(w1.shape, const_map), pl.BlockSpec(b1.shape, const_map),
            pl.BlockSpec(w2.shape, const_map), pl.BlockSpec(b2.shape, const_map),
            pl.BlockSpec(w3.shape, const_map), pl.BlockSpec(b3.shape, const_map),
            pl.BlockSpec(w4.shape, const_map), pl.BlockSpec(b4.shape, const_map),
        ],
        out_specs=pl.BlockSpec((tb_eff, D4), row_map),
        compiler_params=pltpu.CompilerParams(
            dimension_semantics=("parallel",),
            vmem_limit_bytes=vmem_limit),
        cost_estimate=cost,
    )(x, w1, b1, w2, b2, w3, b3, w4, b4)

    # Unflatten(1, (CHANNELS, IMAGE_SIZE, IMAGE_SIZE)) -> NCHW (layout glue).
    return flat[:B].reshape(B, CHANNELS, IMAGE_SIZE, IMAGE_SIZE)


def generator_reference_mixed(x, packed_params, out_dtype=jnp.bfloat16):
    """Pure-JAX replica of the kernel's mixed-precision numerics."""
    h = x.astype(jnp.bfloat16)
    out = None
    for i, (w, b) in enumerate(packed_params):
        z = jnp.dot(h, w, preferred_element_type=jnp.float32) + b
        if i < 3:
            h = _leaky_relu(z).astype(jnp.bfloat16)
        else:
            out = jnp.tanh(z).astype(out_dtype)
    return out.reshape(x.shape[0], CHANNELS, IMAGE_SIZE, IMAGE_SIZE)


def generator_reference_f32(x, params_f32):
    """Full-precision reference matching the PyTorch module semantics."""
    h = x
    for i, (w, b) in enumerate(params_f32):
        h = h @ w + b
        if i < 3:
            h = _leaky_relu(h)
    return jnp.tanh(h).reshape(x.shape[0], CHANNELS, IMAGE_SIZE, IMAGE_SIZE)


if __name__ == "__main__":
    key = jax.random.PRNGKey(0)
    kx, kp = jax.random.split(key)

    params_f32 = init_params(kp)
    packed = pack_params(params_f32)

    # --- Small smoke test: batch=2, single grid step, bf16 output (default).
    batch = 2
    x = jax.random.normal(kx, (batch, LATENT_DIM), jnp.float32)

    out = jax.block_until_ready(generator_forward(x, packed))
    assert out.shape == (batch, CHANNELS, IMAGE_SIZE, IMAGE_SIZE), out.shape

    # Tight check vs. a pure-JAX replica of the kernel's bf16/f32 numerics.
    ref_mixed = generator_reference_mixed(x, packed)
    assert jnp.allclose(out.astype(jnp.float32), ref_mixed.astype(jnp.float32),
                        atol=1e-2, rtol=1e-2), "mismatch vs mixed-precision reference"

    # Loose check vs. the full-f32 PyTorch-equivalent forward (bf16 weights /
    # activations / output; tanh output bounded in [-1, 1]).
    ref_f32 = generator_reference_f32(x, params_f32)
    assert jnp.allclose(out.astype(jnp.float32), ref_f32,
                        atol=5e-2, rtol=5e-2), "mismatch vs f32 reference"

    # --- Multi-tile grid (2 steps), batch padding, and f32 output path.
    batch2 = 48
    x2 = jax.random.normal(kx, (batch2, LATENT_DIM), jnp.float32)
    out2 = jax.block_until_ready(
        generator_forward(x2, packed, out_dtype=jnp.float32))
    assert out2.shape == (batch2, CHANNELS, IMAGE_SIZE, IMAGE_SIZE), out2.shape
    ref2 = generator_reference_f32(x2, params_f32)
    assert jnp.allclose(out2, ref2, atol=5e-2, rtol=5e-2), \
        "mismatch vs f32 reference (multi-tile)"

    print("KERNEL_OK")
</pallas_src>

<mosaic_0001>
module attributes {stable_mosaic.version = 11 : i64} {
  func.func @generator_kernel(%arg0: i32, %arg1: memref<8x32xbf16, #tpu.memory_space<vmem>>, %arg2: memref<32x256xbf16, #tpu.memory_space<vmem>>, %arg3: memref<1x256xf32, #tpu.memory_space<vmem>>, %arg4: memref<256x384xbf16, #tpu.memory_space<vmem>>, %arg5: memref<1x384xf32, #tpu.memory_space<vmem>>, %arg6: memref<384x640xbf16, #tpu.memory_space<vmem>>, %arg7: memref<1x640xf32, #tpu.memory_space<vmem>>, %arg8: memref<640x1024xbf16, #tpu.memory_space<vmem>>, %arg9: memref<1x1024xf32, #tpu.memory_space<vmem>>, %arg10: memref<8x1024xbf16, #tpu.memory_space<vmem>>) attributes {dimension_semantics = [#tpu.dimension_semantics<parallel>], iteration_bounds = array<i64: 1>, scalar_prefetch = 0 : i64, scratch_operands = 0 : i64, tpu.core_type = #tpu.core_type<tc>, window_params = [{transform_indices = @transform_0, window_bounds = array<i64: 8, 32>}, {pipeline_mode = #tpu.pipeline_mode<synchronous>, transform_indices = @transform_1, window_bounds = array<i64: 32, 256>}, {pipeline_mode = #tpu.pipeline_mode<synchronous>, transform_indices = @transform_2, window_bounds = array<i64: 1, 256>}, {pipeline_mode = #tpu.pipeline_mode<synchronous>, transform_indices = @transform_3, window_bounds = array<i64: 256, 384>}, {pipeline_mode = #tpu.pipeline_mode<synchronous>, transform_indices = @transform_4, window_bounds = array<i64: 1, 384>}, {pipeline_mode = #tpu.pipeline_mode<synchronous>, transform_indices = @transform_5, window_bounds = array<i64: 384, 640>}, {pipeline_mode = #tpu.pipeline_mode<synchronous>, transform_indices = @transform_6, window_bounds = array<i64: 1, 640>}, {pipeline_mode = #tpu.pipeline_mode<synchronous>, transform_indices = @transform_7, window_bounds = array<i64: 640, 1024>}, {pipeline_mode = #tpu.pipeline_mode<synchronous>, transform_indices = @transform_8, window_bounds = array<i64: 1, 1024>}, {transform_indices = @transform_9, window_bounds = array<i64: 8, 1024>}]} {
    %c0 = arith.constant 0 : index
    %c0_0 = arith.constant 0 : index
    %0 = vector.load %arg1[%c0, %c0_0] : memref<8x32xbf16, #tpu.memory_space<vmem>>, vector<8x32xbf16>
    %c0_1 = arith.constant 0 : index
    %c0_2 = arith.constant 0 : index
    %1 = vector.load %arg2[%c0_1, %c0_2] : memref<32x256xbf16, #tpu.memory_space<vmem>>, vector<32x256xbf16>
    %cst = arith.constant dense<0.000000e+00> : vector<8x256xf32>
    %2 = tpu.matmul %0, %1, %cst {dimension_numbers = #tpu.dot_dimension_numbers<[1], [0], [0], [1], [0, 0, 1, 1], [], []>} : vector<8x32xbf16>, vector<32x256xbf16>, vector<8x256xf32> -> vector<8x256xf32>
    %c0_3 = arith.constant 0 : index
    %c0_4 = arith.constant 0 : index
    %3 = vector.load %arg3[%c0_3, %c0_4] : memref<1x256xf32, #tpu.memory_space<vmem>>, vector<1x256xf32>
    %4 = vector.broadcast %3 : vector<1x256xf32> to vector<8x256xf32>
    %5 = arith.addf %2, %4 : vector<8x256xf32>
    %cst_5 = arith.constant 0.00999999977 : f32
    %6 = vector.broadcast %cst_5 : f32 to vector<8x256xf32>
    %7 = arith.mulf %6, %5 : vector<8x256xf32>
    %8 = arith.maximumf %5, %7 : vector<8x256xf32>
    %9 = arith.truncf %8 : vector<8x256xf32> to vector<8x256xbf16>
    %c0_6 = arith.constant 0 : index
    %c0_7 = arith.constant 0 : index
    %10 = vector.load %arg4[%c0_6, %c0_7] : memref<256x384xbf16, #tpu.memory_space<vmem>>, vector<256x384xbf16>
    %cst_8 = arith.constant dense<0.000000e+00> : vector<8x384xf32>
    %11 = tpu.matmul %9, %10, %cst_8 {dimension_numbers = #tpu.dot_dimension_numbers<[1], [0], [0], [1], [0, 0, 1, 1], [], []>} : vector<8x256xbf16>, vector<256x384xbf16>, vector<8x384xf32> -> vector<8x384xf32>
    %c0_9 = arith.constant 0 : index
    %c0_10 = arith.constant 0 : index
    %12 = vector.load %arg5[%c0_9, %c0_10] : memref<1x384xf32, #tpu.memory_space<vmem>>, vector<1x384xf32>
    %13 = vector.broadcast %12 : vector<1x384xf32> to vector<8x384xf32>
    %14 = arith.addf %11, %13 : vector<8x384xf32>
    %cst_11 = arith.constant 0.00999999977 : f32
    %15 = vector.broadcast %cst_11 : f32 to vector<8x384xf32>
    %16 = arith.mulf %15, %14 : vector<8x384xf32>
    %17 = arith.maximumf %14, %16 : vector<8x384xf32>
    %18 = arith.truncf %17 : vector<8x384xf32> to vector<8x384xbf16>
    %c0_12 = arith.constant 0 : index
    %c0_13 = arith.constant 0 : index
    %19 = vector.load %arg6[%c0_12, %c0_13] : memref<384x640xbf16, #tpu.memory_space<vmem>>, vector<384x640xbf16>
    %cst_14 = arith.constant dense<0.000000e+00> : vector<8x640xf32>
    %20 = tpu.matmul %18, %19, %cst_14 {dimension_numbers = #tpu.dot_dimension_numbers<[1], [0], [0], [1], [0, 0, 1, 1], [], []>} : vector<8x384xbf16>, vector<384x640xbf16>, vector<8x640xf32> -> vector<8x640xf32>
    %c0_15 = arith.constant 0 : index
    %c0_16 = arith.constant 0 : index
    %21 = vector.load %arg7[%c0_15, %c0_16] : memref<1x640xf32, #tpu.memory_space<vmem>>, vector<1x640xf32>
    %22 = vector.broadcast %21 : vector<1x640xf32> to vector<8x640xf32>
    %23 = arith.addf %20, %22 : vector<8x640xf32>
    %cst_17 = arith.constant 0.00999999977 : f32
    %24 = vector.broadcast %cst_17 : f32 to vector<8x640xf32>
    %25 = arith.mulf %24, %23 : vector<8x640xf32>
    %26 = arith.maximumf %23, %25 : vector<8x640xf32>
    %27 = arith.truncf %26 : vector<8x640xf32> to vector<8x640xbf16>
    %c0_18 = arith.constant 0 : index
    %c0_19 = arith.constant 0 : index
    %28 = vector.load %arg8[%c0_18, %c0_19] : memref<640x1024xbf16, #tpu.memory_space<vmem>>, vector<640x1024xbf16>
    %cst_20 = arith.constant dense<0.000000e+00> : vector<8x1024xf32>
    %29 = tpu.matmul %27, %28, %cst_20 {dimension_numbers = #tpu.dot_dimension_numbers<[1], [0], [0], [1], [0, 0, 1, 1], [], []>} : vector<8x640xbf16>, vector<640x1024xbf16>, vector<8x1024xf32> -> vector<8x1024xf32>
    %c0_21 = arith.constant 0 : index
    %c0_22 = arith.constant 0 : index
    %30 = vector.load %arg9[%c0_21, %c0_22] : memref<1x1024xf32, #tpu.memory_space<vmem>>, vector<1x1024xf32>
    %31 = vector.broadcast %30 : vector<1x1024xf32> to vector<8x1024xf32>
    %32 = arith.addf %29, %31 : vector<8x1024xf32>
    %33 = math.tanh %32 : vector<8x1024xf32>
    %34 = arith.truncf %33 : vector<8x1024xf32> to vector<8x1024xbf16>
    %c0_23 = arith.constant 0 : index
    %c0_24 = arith.constant 0 : index
    %35 = vector.load %arg10[%c0_23, %c0_24] : memref<8x1024xbf16, #tpu.memory_space<vmem>>, vector<8x1024xbf16>
    tpu.vector_store %arg10[%c0_23, %c0_24], %34 {strides = array<i32>} : memref<8x1024xbf16, #tpu.memory_space<vmem>>, vector<8x1024xbf16>,
    return
  }
  func.func @transform_0(%arg0: i32) -> (i32, i32) {
    %c0_i32 = arith.constant 0 : i32
    %c0_i32_0 = arith.constant 0 : i32
    return %arg0, %c0_i32 : i32, i32
  }
  func.func @transform_1(%arg0: i32) -> (i32, i32) {
    %c0_i32 = arith.constant 0 : i32
    %c0_i32_0 = arith.constant 0 : i32
    %c0_i32_1 = arith.constant 0 : i32
    return %c0_i32, %c0_i32_0 : i32, i32
  }
  func.func @transform_2(%arg0: i32) -> (i32, i32) {
    %c0_i32 = arith.constant 0 : i32
    %c0_i32_0 = arith.constant 0 : i32
    %c0_i32_1 = arith.constant 0 : i32
    return %c0_i32, %c0_i32_0 : i32, i32
  }
  func.func @transform_3(%arg0: i32) -> (i32, i32) {
    %c0_i32 = arith.constant 0 : i32
    %c0_i32_0 = arith.constant 0 : i32
    %c0_i32_1 = arith.constant 0 : i32
    return %c0_i32, %c0_i32_0 : i32, i32
  }
  func.func @transform_4(%arg0: i32) -> (i32, i32) {
    %c0_i32 = arith.constant 0 : i32
    %c0_i32_0 = arith.constant 0 : i32
    %c0_i32_1 = arith.constant 0 : i32
    return %c0_i32, %c0_i32_0 : i32, i32
  }
  func.func @transform_5(%arg0: i32) -> (i32, i32) {
    %c0_i32 = arith.constant 0 : i32
    %c0_i32_0 = arith.constant 0 : i32
    %c0_i32_1 = arith.constant 0 : i32
    return %c0_i32, %c0_i32_0 : i32, i32
  }
  func.func @transform_6(%arg0: i32) -> (i32, i32) {
    %c0_i32 = arith.constant 0 : i32
    %c0_i32_0 = arith.constant 0 : i32
    %c0_i32_1 = arith.constant 0 : i32
    return %c0_i32, %c0_i32_0 : i32, i32
  }
  func.func @transform_7(%arg0: i32) -> (i32, i32) {
    %c0_i32 = arith.constant 0 : i32
    %c0_i32_0 = arith.constant 0 : i32
    %c0_i32_1 = arith.constant 0 : i32
    return %c0_i32, %c0_i32_0 : i32, i32
  }
  func.func @transform_8(%arg0: i32) -> (i32, i32) {
    %c0_i32 = arith.constant 0 : i32
    %c0_i32_0 = arith.constant 0 : i32
    %c0_i32_1 = arith.constant 0 : i32
    return %c0_i32, %c0_i32_0 : i32, i32
  }
  func.func @transform_9(%arg0: i32) -> (i32, i32) {
    %c0_i32 = arith.constant 0 : i32
    %c0_i32_0 = arith.constant 0 : i32
    return %arg0, %c0_i32 : i32, i32
  }
}

</mosaic_0001>

<bundles_post_ra>
// kernel: tpu_custom_call.1
= control target key start
LH: loop header
LB: loop body
LE: loop exit
PB: predicated region body
PF: predicated region fallthrough
CT: control target
= control target key end

     0   :  { %14 = vsyncpa [#allocation3], 0  ;;  %s5546_s0 = inlined_call_operand.hbm [shape: bf16[8,32], index: 0, kind: input, shape index: {}]   ;;  %s5547_s1 = inlined_call_operand.hbm [shape: bf16[32,256], index: 1, kind: input, shape index: {}]   ;;  %s5548_s2 = inlined_call_operand.hbm [shape: f32[1,256], index: 2, kind: input, shape index: {}]   ;;  %s5549_s3 = inlined_call_operand.hbm [shape: bf16[256,384], index: 3, kind: input, shape index: {}]   ;;  %s5550_s4 = inlined_call_operand.hbm [shape: f32[1,384], index: 4, kind: input, shape index: {}]   ;;  %s5551_s5 = inlined_call_operand.hbm [shape: bf16[384,640], index: 5, kind: input, shape index: {}]   ;;  %s5552_s6 = inlined_call_operand.hbm [shape: f32[1,640], index: 6, kind: input, shape index: {}]   ;;  %s5553_s7 = inlined_call_operand.hbm [shape: bf16[640,1024], index: 7, kind: input, shape index: {}]   ;;  %s5554_s8 = inlined_call_operand.hbm [shape: f32[1,1024], index: 8, kind: input, shape index: {}]   ;;  %s5555_s9 = inlined_call_operand.hbm [shape: bf16[8,1024], index: 9, kind: output, shape index: {}]  }
   0x1   :  { %15 = vsyncpa [#allocation6], 0 }
   0x2   :  { %16 = vsyncpa [#allocation9], 0 }
   0x3   :  { %17 = vsyncpa [#allocation12], 0 }
   0x4   :  { %18 = vsyncpa [#allocation15], 0 }
   0x5   :  { %19 = vsyncpa [#allocation4], 0  ;;  %s5293_s30 = smov [#allocation5]  }
   0x6   :  { %s35_s10 = sshll.u32 %s5293_s30, 4  ;;  %s36_s10 = int_to_ptr.vmem [resolvable:$true] %s35_s10 }
   0x7   :  { %s5089_s11 = scalar_lea.vmem %s36_s10, 512  ;;  %p5094_p1 = scmp.lt.s32.totalorder %s36_s10, %s36_s10 }
   0x8   :  { %p5090_p0 = scmp.ne.s32.totalorder %s36_s10, %s5089_s11  ;;  %p5095_p2 = scmp.lt.s32.totalorder %s5089_s11, %s5089_s11 }
   0xa   :  { %p5096_p3 = por %p5095_p2, %p5094_p1 }
   0xc   :  { %p5097_p4 = pnand %p5096_p3, %p5090_p0 }
   0xe   :  { %5100 = shalt.err (!%p5097_p4)
}
   0xf   :  { %s5294_s12 = smov 128   ;;  %s5295_s13 = smov 8  }
  0x10   :  { %41 = dma.hbm_to_vmem [thread:$0]  %s5547_s1, 512, %s36_s10, [#allocation6], %s5294_s12, %s5294_s12, %s5295_s13  }
  0x11   :  { %s5296_s16 = smov [#allocation8]  }
  0x12   :  { %s57_s17 = sshll.u32 %s5296_s16, 4  ;;  %s58_s17 = int_to_ptr.vmem [resolvable:$true] %s57_s17 }
  0x13   :  { %s5109_s18 = scalar_lea.vmem %s58_s17, 6144  ;;  %p5114_p6 = scmp.lt.s32.totalorder %s58_s17, %s58_s17 }
  0x14   :  { %p5110_p5 = scmp.ne.s32.totalorder %s58_s17, %s5109_s18  ;;  %p5115_p7 = scmp.lt.s32.totalorder %s5109_s18, %s5109_s18 }
  0x16   :  { %p5116_p8 = por %p5115_p7, %p5114_p6 }
  0x18   :  { %p5117_p9 = pnand %p5116_p8, %p5110_p5 }
  0x1a   :  { %5120 = shalt.err (!%p5117_p9)
}
  0x1b   :  { %s5297_s19 = smov 192   ;;  %s5298_s20 = smov 12  }
  0x1c   :  { %63 = dma.hbm_to_vmem [thread:$0]  %s5549_s3, 6144, %s58_s17, [#allocation9], %s5297_s19, %s5297_s19, %s5298_s20  }
  0x1d   :  { %s5299_s23 = smov [#allocation11]  }
  0x1e   :  { %s79_s24 = sshll.u32 %s5299_s23, 4  ;;  %s80_s24 = int_to_ptr.vmem [resolvable:$true] %s79_s24 }
  0x1f   :  { %s5129_s1 = scalar_lea.vmem %s80_s24, 15360  ;;  %p5134_p11 = scmp.lt.s32.totalorder %s80_s24, %s80_s24 }
  0x20   :  { %p5130_p10 = scmp.ne.s32.totalorder %s80_s24, %s5129_s1  ;;  %p5135_p12 = scmp.lt.s32.totalorder %s5129_s1, %s5129_s1 }
  0x22   :  { %p5136_p13 = por %p5135_p12, %p5134_p11 }
  0x24   :  { %p5137_p0 = pnand %p5136_p13, %p5130_p10 }
  0x26   :  { %5140 = shalt.err (!%p5137_p0)
}
  0x27   :  { %s5300_s25 = smov 320   ;;  %s5301_s26 = smov 20  }
  0x28   :  { %85 = dma.hbm_to_vmem [thread:$0]  %s5551_s5, 15360, %s80_s24, [#allocation12], %s5300_s25, %s5300_s25, %s5301_s26  }
  0x29   :  { %s5302_s29 = smov [#allocation14]  }
  0x2a   :  { %s101_s30 = sshll.u32 %s5302_s29, 4  ;;  %s102_s30 = int_to_ptr.vmem [resolvable:$true] %s101_s30 }
  0x2b   :  { %s5149_s3 = scalar_lea.vmem %s102_s30, 40960  ;;  %p5154_p2 = scmp.lt.s32.totalorder %s102_s30, %s102_s30 }
  0x2c   :  { %p5150_p1 = scmp.ne.s32.totalorder %s102_s30, %s5149_s3  ;;  %p5155_p3 = scmp.lt.s32.totalorder %s5149_s3, %s5149_s3 }
  0x2e   :  { %p5156_p4 = por %p5155_p3, %p5154_p2 }
  0x30   :  { %p5157_p5 = pnand %p5156_p4, %p5150_p1 }
  0x32   :  { %5160 = shalt.err (!%p5157_p5)
}
  0x33   :  { %s5303_s10 = smov 512   ;;  %s5304_s11 = smov 32  }
  0x34   :  { %107 = dma.hbm_to_vmem [thread:$0]  %s5553_s7, 40960, %s102_s30, [#allocation15], %s5303_s10, %s5303_s10, %s5304_s11  }
  0x35   :  { %s5305_s14 = smov [#allocation2]   ;;  %s5306_s16 = smov [#allocation7]  }
  0x36   :  { %s26_s15 = sshll.u32 %s5305_s14, 4  ;;  %s48_s5 = sshll.u32 %s5306_s16, 4  ;;  %s27_s15 = int_to_ptr.vmem [resolvable:$true] %s26_s15  ;;  %s49_s5 = int_to_ptr.vmem [resolvable:$true] %s48_s5 }
  0x37   :  { %s5169_s17 = scalar_lea.vmem %s27_s15, 64  ;;  %p5174_p7 = scmp.lt.s32.totalorder %s27_s15, %s27_s15 }
  0x38   :  { %p5170_p6 = scmp.ne.s32.totalorder %s27_s15, %s5169_s17  ;;  %p5175_p8 = scmp.lt.s32.totalorder %s5169_s17, %s5169_s17 }
  0x3a   :  { %p5176_p9 = por %p5175_p8, %p5174_p7 }
  0x3c   :  { %p5177_p10 = pnand %p5176_p9, %p5170_p6 }
  0x3e   :  { %5180 = shalt.err (!%p5177_p10)
}
  0x3f   :  { %29 = dma.hbm_to_vmem [thread:$0]  %s5546_s0, 64, %s27_s15, [#allocation3]  }
  0x40   :  { %s5189_s20 = scalar_lea.vmem %s49_s5, 32  ;;  %p5194_p12 = scmp.lt.s32.totalorder %s49_s5, %s49_s5 }
  0x41   :  { %p5190_p11 = scmp.ne.s32.totalorder %s49_s5, %s5189_s20  ;;  %p5195_p13 = scmp.lt.s32.totalorder %s5189_s20, %s5189_s20 }
  0x43   :  { %p5196_p0 = por %p5195_p13, %p5194_p12 }
  0x45   :  { %p5197_p1 = pnand %p5196_p0, %p5190_p11 }
  0x47   :  { %5200 = shalt.err (!%p5197_p1)
}
  0x48   :  { %51 = dma.hbm_to_vmem [thread:$0]  %s5548_s2, 32, %s49_s5, [#allocation6]  }
  0x49   :  { %s5307_s22 = smov [#allocation10]   ;;  %s5308_s24 = smov [#allocation13]  }
  0x4a   :  { %s70_s23 = sshll.u32 %s5307_s22, 4  ;;  %s92_s1 = sshll.u32 %s5308_s24, 4  ;;  %s71_s23 = int_to_ptr.vmem [resolvable:$true] %s70_s23  ;;  %s93_s1 = int_to_ptr.vmem [resolvable:$true] %s92_s1 }
  0x4b   :  { %s5209_s25 = scalar_lea.vmem %s71_s23, 48  ;;  %s5213_s0 = scalar_lea.vmem %s71_s23, 64 }
  0x4c   :  { %p5210_p2 = scmp.ne.s32.totalorder %s71_s23, %s5209_s25  ;;  %p5214_p3 = scmp.lt.s32.totalorder %s71_s23, %s71_s23 }
  0x4d   :  { %p5215_p4 = scmp.lt.s32.totalorder %s5213_s0, %s5209_s25 }
  0x4f   :  { %p5216_p5 = por %p5215_p4, %p5214_p3 }
  0x51   :  { %p5217_p6 = pnand %p5216_p5, %p5210_p2 }
  0x53   :  { %5220 = shalt.err (!%p5217_p6)
}
  0x54   :  { %73 = dma.hbm_to_vmem [thread:$0]  %s5550_s4, 48, %s71_s23, [#allocation9]  }
  0x55   :  { %s5229_s28 = scalar_lea.vmem %s93_s1, 80  ;;  %s5233_s2 = scalar_lea.vmem %s93_s1, 96 }
  0x56   :  { %p5230_p7 = scmp.ne.s32.totalorder %s93_s1, %s5229_s28  ;;  %p5234_p8 = scmp.lt.s32.totalorder %s93_s1, %s93_s1 }
  0x57   :  { %p5235_p9 = scmp.lt.s32.totalorder %s5233_s2, %s5229_s28 }
  0x59   :  { %p5236_p10 = por %p5235_p9, %p5234_p8 }
  0x5b   :  { %p5237_p11 = pnand %p5236_p10, %p5230_p7 }
  0x5d   :  { %5240 = shalt.err (!%p5237_p11)
}
  0x5e   :  { %95 = dma.hbm_to_vmem [thread:$0]  %s5552_s6, 80, %s93_s1, [#allocation12]  }
  0x5f   :  { %s5309_s3 = smov [#allocation16]  }
  0x60   :  { %s114_s10 = sshll.u32 %s5309_s3, 4  ;;  %s115_s10 = int_to_ptr.vmem [resolvable:$true] %s114_s10 }
  0x61   :  { %s5249_s11 = scalar_lea.vmem %s115_s10, 128  ;;  %p5254_p13 = scmp.lt.s32.totalorder %s115_s10, %s115_s10 }
  0x62   :  { %p5250_p12 = scmp.ne.s32.totalorder %s115_s10, %s5249_s11  ;;  %p5255_p0 = scmp.lt.s32.totalorder %s5249_s11, %s5249_s11 }
  0x64   :  { %p5256_p1 = por %p5255_p0, %p5254_p13 }
  0x66   :  { %p5257_p2 = pnand %p5256_p1, %p5250_p12 }
  0x68   :  { %5260 = shalt.err (!%p5257_p2)
}
  0x69   :  { %117 = dma.hbm_to_vmem [thread:$0]  %s5554_s8, 128, %s115_s10, [#allocation15]  }
  0x6a   :  { %5281 = dma.done.wait [#allocation3], 64  }
  0x6b   :  { %5282 = vsyncadd [#allocation3], 4294967232 }
  0x6c   :  { %5283 = dma.done.wait [#allocation6], 544  }
  0x6d   :  { %5284 = vsyncadd [#allocation6], 4294966752 }
  0x6e   :  { %5285 = dma.done.wait [#allocation9], 6192  }
  0x6f   :  { %5286 = vsyncadd [#allocation9], 4294961104 }
  0x70   :  { %5287 = dma.done.wait [#allocation12], 15440  }
  0x71   :  { %5288 = vsyncadd [#allocation12], 4294951856 }
  0x72   :  { %5289 = dma.done.wait [#allocation15], 41088  }
  0x73   :  { %5290 = vsyncadd [#allocation15], 4294926208  ;;  %v5310_v0 = vmov 0   ;;  %v4827_v1 = vld [vmem:[#allocation5 + $0x14] ss:$8 sps:$4 sm:$0xff]   ;;  %vm183_vm0 = vcmask 261120   ;;  %v153_v56 = vlaneseq }
  0x74   :  { %219 = vmatprep.mubr.bf16.mxu0 %v5310_v0  ;;  %v4829_v2 = vld [vmem:[#allocation5 + $0x10] ss:$8 sps:$4 sm:$0xff]   ;;  %199 = vmatprep.subr.bf16.mxu0 %v4827_v1  ;;  %v4830_v3 = vld [vmem:[#allocation5 + $0x4] ss:$8 sps:$4 sm:$0xff]   ;;  %v4832_v4 = vld [vmem:[#allocation5] ss:$8 sps:$4 sm:$0xff]  }
  0x75   :  { %200 = vmatpush1.bf16.msra.mxu0 %v4829_v2  ;;  %v4833_v5 = vld [vmem:[#allocation8 + $0xac] ss:$12 sps:$4 sm:$0xff]   ;;  %v4835_v6 = vld [vmem:[#allocation8 + $0xa8] ss:$12 sps:$4 sm:$0xff]   ;;  %v4838_v9 = vld [vmem:[#allocation8 + $0x90] ss:$12 sps:$4 sm:$0xff]  }
  0x76   :  { %201 = vmatprep.subr.bf16.mxu0 %v4830_v3  ;;  %571 = vmatprep.subr.bf16.mxu1 %v4833_v5  ;;  %v4836_v7 = vld [vmem:[#allocation8 + $0x94] ss:$12 sps:$4 sm:$0xff]   ;;  %v146_v8 = vld [vmem:[#allocation2] sm:$0xf]  ;;  %v4842_v12 = vld [vmem:[#allocation8 + $0x64] ss:$12 sps:$4 sm:$0xff]  }
  0x77   :  { %572 = vmatpush1.bf16.msra.mxu1 %v4835_v6  ;;  %v4839_v10 = vld [vmem:[#allocation8 + $0x7c] ss:$12 sps:$4 sm:$0xff]   ;;  %v4841_v11 = vld [vmem:[#allocation8 + $0x78] ss:$12 sps:$4 sm:$0xff]   ;;  %v4844_v13 = vld [vmem:[#allocation8 + $0x60] ss:$12 sps:$4 sm:$0xff]  }
  0x78   :  { %573 = vmatprep.subr.bf16.mxu1 %v4836_v7  ;;  %v4845_v14 = vld [vmem:[#allocation8 + $0x4c] ss:$12 sps:$4 sm:$0xff]   ;;  %v4859_v15 = vld [vmem:[#allocation8 + $0x170] ss:$12 sps:$4 sm:$0xff]   ;;  %v4847_v17 = vld [vmem:[#allocation8 + $0x48] ss:$12 sps:$4 sm:$0xff]  }
  0x79   :  { %202 = vmatpush1.bf16.msra.mxu0 %v4832_v4  ;;  %v4861_v16 = vld [vmem:[#allocation8 + $0xb0] ss:$12 sps:$4 sm:$0xff]   ;;  %v4864_v18 = vld [vmem:[#allocation8 + $0x158] ss:$12 sps:$4 sm:$0xff]   ;;  %v4848_v19 = vld [vmem:[#allocation8 + $0x34] ss:$12 sps:$4 sm:$0xff]  }
  0x7a   :  { %4733 = vmatprep.subr.bf16.mxu0 %v4859_v15  ;;  %v4866_v20 = vld [vmem:[#allocation8 + $0x98] ss:$12 sps:$4 sm:$0xff]   ;;  %v4850_v21 = vld [vmem:[#allocation8 + $0x30] ss:$12 sps:$4 sm:$0xff]   ;;  %v4869_v23 = vld [vmem:[#allocation8 + $0x140] ss:$12 sps:$4 sm:$0xff]  }
  0x7b   :  { %574 = vmatpush1.bf16.msra.mxu1 %v4838_v9  ;;  %v4851_v22 = vld [vmem:[#allocation8 + $0x1c] ss:$12 sps:$4 sm:$0xff]   ;;  %v4871_v24 = vld [vmem:[#allocation8 + $0x80] ss:$12 sps:$4 sm:$0xff]   ;;  %v4853_v25 = vld [vmem:[#allocation8 + $0x18] ss:$12 sps:$4 sm:$0xff]  }
  0x7c   :  { %4236 = vmatmul.mubr.msk.bf16.vlgmr.msra.gmra.mxu0 %vm183_vm0, %v146_v8  ;;  %575 = vmatprep.subr.bf16.mxu1 %v4839_v10  ;;  %v4874_v26 = vld [vmem:[#allocation8 + $0x128] ss:$12 sps:$4 sm:$0xff]   ;;  %v4854_v28 = vld [vmem:[#allocation8 + $0x4] ss:$12 sps:$4 sm:$0xff]   ;;  %v4856_v30 = vld [vmem:[#allocation8] ss:$12 sps:$4 sm:$0xff]  }
  0x7d   :  { %4734 = vmatpush3.bf16.msra.mxu0 %v4861_v16  ;;  %v4876_v27 = vld [vmem:[#allocation8 + $0x68] ss:$12 sps:$4 sm:$0xff]   ;;  %v4879_v29 = vld [vmem:[#allocation8 + $0x110] ss:$12 sps:$4 sm:$0xff]   ;;  %v4857_v31 = vld [vmem:[#allocation8 + $0x16c] ss:$12 sps:$4 sm:$0xff]  }
  0x7e   :  { %4735 = vmatprep.subr.bf16.mxu0 %v4864_v18  ;;  %v4881_v32 = vld [vmem:[#allocation8 + $0x50] ss:$12 sps:$4 sm:$0xff]   ;;  %v4860_v33 = vld [vmem:[#allocation8 + $0x168] ss:$12 sps:$4 sm:$0xff]   ;;  %v4870_v37 = vld [vmem:[#allocation8 + $0x138] ss:$12 sps:$4 sm:$0xff]  }
  0x7f   :  { %576 = vmatpush1.bf16.msra.mxu1 %v4841_v11  ;;  %v4862_v34 = vld [vmem:[#allocation8 + $0x154] ss:$12 sps:$4 sm:$0xff]   ;;  %v4865_v35 = vld [vmem:[#allocation8 + $0x150] ss:$12 sps:$4 sm:$0xff]   ;;  %v4877_v40 = vld [vmem:[#allocation8 + $0x10c] ss:$12 sps:$4 sm:$0xff]  }
  0x80   :  { %577 = vmatprep.subr.bf16.mxu1 %v4842_v12  ;;  %v4867_v36 = vld [vmem:[#allocation8 + $0x13c] ss:$12 sps:$4 sm:$0xff]   ;;  %v4872_v38 = vld [vmem:[#allocation8 + $0x124] ss:$12 sps:$4 sm:$0xff]   ;;  %v4875_v39 = vld [vmem:[#allocation8 + $0x120] ss:$12 sps:$4 sm:$0xff]  }
  0x81   :  { %4736 = vmatpush3.bf16.msra.mxu0 %v4866_v20  ;;  %v4880_v41 = vld [vmem:[#allocation8 + $0x108] ss:$12 sps:$4 sm:$0xff]   ;;  %v4884_v43 = vld [vmem:[#allocation8 + $0xf8] ss:$12 sps:$4 sm:$0xff]   ;;  %v4885_v44 = vld [vmem:[#allocation8 + $0xf0] ss:$12 sps:$4 sm:$0xff]  }
  0x82   :  { %4737 = vmatprep.subr.bf16.mxu0 %v4869_v23  ;;  %v4882_v42 = vld [vmem:[#allocation8 + $0xf4] ss:$12 sps:$4 sm:$0xff]   ;;  %v4886_v45 = vld [vmem:[#allocation8 + $0x38] ss:$12 sps:$4 sm:$0xff]   ;;  %v4887_v46 = vld [vmem:[#allocation8 + $0xdc] ss:$12 sps:$4 sm:$0xff]  }
  0x83   :  { %578 = vmatpush1.bf16.msra.mxu1 %v4844_v13  ;;  %v4889_v47 = vld [vmem:[#allocation8 + $0xe0] ss:$12 sps:$4 sm:$0xff]   ;;  %v4890_v48 = vld [vmem:[#allocation8 + $0xd8] ss:$12 sps:$4 sm:$0xff]   ;;  %v4894_v51 = vld [vmem:[#allocation8 + $0xc8] ss:$12 sps:$4 sm:$0xff]  }
  0x84   :  { %579 = vmatprep.subr.bf16.mxu1 %v4845_v14  ;;  %v4891_v49 = vld [vmem:[#allocation8 + $0x20] ss:$12 sps:$4 sm:$0xff]   ;;  %v4892_v50 = vld [vmem:[#allocation8 + $0xc4] ss:$12 sps:$4 sm:$0xff]   ;;  %v4896_v53 = vld [vmem:[#allocation8 + $0x8] ss:$12 sps:$4 sm:$0xff]  }
  0x85   :  { %4738 = vmatpush3.bf16.msra.mxu0 %v4871_v24  ;;  %v4895_v52 = vld [vmem:[#allocation8 + $0xc0] ss:$12 sps:$4 sm:$0xff]   ;;  %v5392_v57 = vshrl.u32 %v153_v56, 7  ;;  %v151_v59 = vld [vmem:[#allocation7] sm:$0x3]  ;;  %vm5312_vm1 = vmmov 0  }
  0x86   :  { %4739 = vmatprep.subr.bf16.mxu0 %v4874_v26  ;;  %v4899_v54 = vld [vmem:[#allocation11 + $0x11c] ss:$20 sps:$4 sm:$0xff]   ;;  %v4897_v11 = vld [vmem:[#allocation11 + $0x118] ss:$20 sps:$4 sm:$0xff]   ;;  %v4902_v14 = vld [vmem:[#allocation11 + $0xf4] ss:$20 sps:$4 sm:$0xff]  }
  0x87   :  { %580 = vmatpush1.bf16.msra.mxu1 %v4847_v17  ;;  %v4926_v55 = vld [vmem:[#allocation11 + $0x39c] ss:$20 sps:$4 sm:$0xff]   ;;  %v5395_v58 = vsub.s32 0, %v5392_v57  ;;  %v5398_v60 = vsub.s32 1, %v5392_v57  ;;  %v4924_v12 = vld [vmem:[#allocation11 + $0x398] ss:$20 sps:$4 sm:$0xff]  }
  0x88   :  { %581 = vmatprep.subr.bf16.mxu1 %v4848_v19  ;;  %v4932_v15 = vld [vmem:[#allocation11 + $0x374] ss:$20 sps:$4 sm:$0xff]   ;;  %v4900_v16 = vld [vmem:[#allocation11 + $0xf0] ss:$20 sps:$4 sm:$0xff]   ;;  %v4905_v18 = vld [vmem:[#allocation11 + $0xcc] ss:$20 sps:$4 sm:$0xff]  }
  0x89   :  { %4740 = vmatpush3.bf16.msra.mxu0 %v4876_v27  ;;  %v156_v61 = vrot.slane %v151_v59, %v5395_v58  ;;  %v160_v62 = vrot.slane %v151_v59, %v5398_v60  ;;  %v4930_v17 = vld [vmem:[#allocation11 + $0x370] ss:$20 sps:$4 sm:$0xff]   ;;  %v4938_v19 = vld [vmem:[#allocation11 + $0x34c] ss:$20 sps:$4 sm:$0xff]   ;;  %v4903_v20 = vld [vmem:[#allocation11 + $0xc8] ss:$20 sps:$4 sm:$0xff]  }
  0x8a   :  { %4741 = vmatprep.subr.bf16.mxu0 %v4879_v29  ;;  %v4944_v23 = vld [vmem:[#allocation11 + $0x324] ss:$20 sps:$4 sm:$0xff]   ;;  %v4906_v24 = vld [vmem:[#allocation11 + $0xa0] ss:$20 sps:$4 sm:$0xff]   ;;  %v4911_v26 = vld [vmem:[#allocation11 + $0x7c] ss:$20 sps:$4 sm:$0xff]  }
  0x8b   :  { %582 = vmatpush1.bf16.msra.mxu1 %v4850_v21  ;;  %v4936_v21 = vld [vmem:[#allocation11 + $0x348] ss:$20 sps:$4 sm:$0xff]   ;;  %v4948_v29 = vld [vmem:[#allocation11 + $0x2f8] ss:$20 sps:$4 sm:$0xff]   ;;  %v4966_v59 = vld [vmem:[#allocation11 + $0x280] ss:$20 sps:$4 sm:$0xff]  }
  0x8c   :  { %583 = vmatprep.subr.bf16.mxu1 %v4851_v22  ;;  %v4908_v22 = vld [vmem:[#allocation11 + $0xa4] ss:$20 sps:$4 sm:$0xff]   ;;  %v4950_v27 = vld [vmem:[#allocation11 + $0x2fc] ss:$20 sps:$4 sm:$0xff]   ;;  %s5313_s6 = smov [#allocation17]  }
  0x8d   :  { %4742 = vmatpush3.bf16.msra.mxu0 %v4881_v32  ;;  %v4917_v32 = vld [vmem:[#allocation11 + $0x2c] ss:$20 sps:$4 sm:$0xff]   ;;  %v4968_v56 = vld [vmem:[#allocation11 + $0x284] ss:$20 sps:$4 sm:$0xff]   ;;  %s4219_s8 = sshll.u32 %s5313_s6, 4  ;;  %s4220_s8 = int_to_ptr.vmem [resolvable:$true] %s4219_s8 }
  0x8e   :  { %4743 = vmatprep.subr.bf16.mxu0 %v4884_v43  ;;  %v4939_v43 = vld [vmem:[#allocation11 + $0x1e0] ss:$20 sps:$4 sm:$0xff]   ;;  %s5261_s13 = scalar_lea.vmem %s4220_s8, 512  ;;  %p5266_p4 = scmp.lt.s32.totalorder %s4220_s8, %s4220_s8 }
  0x8f   :  { %584 = vmatpush1.bf16.msra.mxu1 %v4853_v25  ;;  %v4942_v25 = vld [vmem:[#allocation11 + $0x320] ss:$20 sps:$4 sm:$0xff]   ;;  %p5262_p3 = scmp.ne.s32.totalorder %s4220_s8, %s5261_s13  ;;  %p5267_p5 = scmp.lt.s32.totalorder %s5261_s13, %s5261_s13 }
  0x90   :  { %585 = vmatprep.subr.bf16.mxu1 %v4854_v28  ;;  %v4909_v28 = vld [vmem:[#allocation11 + $0x78] ss:$20 sps:$4 sm:$0xff]  }
  0x91   :  { %4744 = vmatpush3.bf16.msra.mxu0 %v4886_v45  ;;  %v4945_v45 = vld [vmem:[#allocation11 + $0x1b8] ss:$20 sps:$4 sm:$0xff]   ;;  %p5268_p6 = por %p5267_p5, %p5266_p4 }
  0x92   :  { %4745 = vmatprep.subr.bf16.mxu0 %v4889_v47  ;;  %v4951_v47 = vld [vmem:[#allocation11 + $0x190] ss:$20 sps:$4 sm:$0xff]  }
  0x93   :  { %586 = vmatpush1.bf16.msra.mxu1 %v4856_v30  ;;  %v4914_v30 = vld [vmem:[#allocation11 + $0x54] ss:$20 sps:$4 sm:$0xff]   ;;  %p5269_p7 = pnand %p5268_p6, %p5262_p3 }
  0x94   :  { %587 = vmatprep.subr.bf16.mxu1 %v4857_v31  ;;  %v4912_v31 = vld [vmem:[#allocation11 + $0x50] ss:$20 sps:$4 sm:$0xff]  }
  0x95   :  { %4746 = vmatpush3.bf16.msra.mxu0 %v4891_v49  ;;  %v4954_v49 = vld [vmem:[#allocation11 + $0x2d0] ss:$20 sps:$4 sm:$0xff]  }
  0x96   :  { %4747 = vmatprep.subr.bf16.mxu0 %v4894_v51  ;;  %v4957_v51 = vld [vmem:[#allocation11 + $0x168] ss:$20 sps:$4 sm:$0xff]  }
  0x97   :  { %588 = vmatpush2.bf16.msra.mxu1 %v4860_v33  ;;  %v4915_v33 = vld [vmem:[#allocation11 + $0x28] ss:$20 sps:$4 sm:$0xff]  }
  0x98   :  { %589 = vmatprep.subr.bf16.mxu1 %v4862_v34  ;;  %v4920_v34 = vld [vmem:[#allocation11 + $0x4] ss:$20 sps:$4 sm:$0xff]  }
  0x99   :  { %4748 = vmatpush3.bf16.msra.mxu0 %v4896_v53  ;;  %v4960_v53 = vld [vmem:[#allocation11 + $0x2a8] ss:$20 sps:$4 sm:$0xff]  }
  0x9a   :  { %1456 = vmatprep.subr.bf16.mxu0 %v4899_v54  ;;  %v4965_v54 = vld [vmem:[#allocation11 + $0x144] ss:$20 sps:$4 sm:$0xff]  }
  0x9b   :  { %590 = vmatpush2.bf16.msra.mxu1 %v4865_v35  ;;  %v4918_v35 = vld [vmem:[#allocation11] ss:$20 sps:$4 sm:$0xff]  }
  0x9c   :  { %591 = vmatprep.subr.bf16.mxu1 %v4867_v36  ;;  %v4923_v36 = vld [vmem:[#allocation11 + $0x25c] ss:$20 sps:$4 sm:$0xff]  }
  0x9f   :  { %592 = vmatpush2.bf16.msra.mxu1 %v4870_v37  ;;  %v4921_v37 = vld [vmem:[#allocation11 + $0x258] ss:$20 sps:$4 sm:$0xff]  }
  0xa0   :  { %593 = vmatprep.subr.bf16.mxu1 %v4872_v38  ;;  %v4929_v38 = vld [vmem:[#allocation11 + $0x234] ss:$20 sps:$4 sm:$0xff]  }
  0xa3   :  { %594 = vmatpush2.bf16.msra.mxu1 %v4875_v39  ;;  %v4927_v39 = vld [vmem:[#allocation11 + $0x230] ss:$20 sps:$4 sm:$0xff]  }
  0xa4   :  { %595 = vmatprep.subr.bf16.mxu1 %v4877_v40  ;;  %v4935_v40 = vld [vmem:[#allocation11 + $0x20c] ss:$20 sps:$4 sm:$0xff]  }
  0xa7   :  { %596 = vmatpush2.bf16.msra.mxu1 %v4880_v41  ;;  %v4933_v41 = vld [vmem:[#allocation11 + $0x208] ss:$20 sps:$4 sm:$0xff]  }
  0xa8   :  { %597 = vmatprep.subr.bf16.mxu1 %v4882_v42  ;;  %v4941_v42 = vld [vmem:[#allocation11 + $0x1e4] ss:$20 sps:$4 sm:$0xff]  }
  0xab   :  { %598 = vmatpush2.bf16.msra.mxu1 %v4885_v44  ;;  %v4947_v44 = vld [vmem:[#allocation11 + $0x1bc] ss:$20 sps:$4 sm:$0xff]  }
  0xac   :  { %599 = vmatprep.subr.bf16.mxu1 %v4887_v46  ;;  %v4953_v46 = vld [vmem:[#allocation11 + $0x194] ss:$20 sps:$4 sm:$0xff]  }
  0xaf   :  { %600 = vmatpush2.bf16.msra.mxu1 %v4890_v48  ;;  %v4956_v48 = vld [vmem:[#allocation11 + $0x2d4] ss:$20 sps:$4 sm:$0xff]  }
  0xb0   :  { %601 = vmatprep.subr.bf16.mxu1 %v4892_v50  ;;  %v4959_v50 = vld [vmem:[#allocation11 + $0x16c] ss:$20 sps:$4 sm:$0xff]  }
  0xb3   :  { %602 = vmatpush2.bf16.msra.mxu1 %v4895_v52  ;;  %v4962_v52 = vld [vmem:[#allocation11 + $0x2ac] ss:$20 sps:$4 sm:$0xff]  }
  0xb4   :  { %1497 = vmatprep.subr.bf16.mxu1 %v4926_v55  ;;  %v4963_v55 = vld [vmem:[#allocation11 + $0x140] ss:$20 sps:$4 sm:$0xff]  }
 0x13c   :  { %v221_v63 = vpop.f32.mrf.mxu0 }
 0x13d   :  { %v222_v1 = vadd.f32 %v221_v63, %v156_v61  ;;  %v4971_v61 = vld [vmem:[#allocation11 + $0x3a4] ss:$20 sps:$4 sm:$0xff]   ;;  %v298_v63 = vld [vmem:[#allocation10] sm:$0x7] }
 0x13e   :  { %v223_v2 = vpop.f32.mrf.mxu0 }
 0x13f   :  { %v228_v3 = vmul.f32 0.01, %v222_v1  ;;  %v224_v4 = vadd.f32 %v223_v2, %v160_v62  ;;  %v4974_v62 = vld [vmem:[#allocation11 + $0x124] ss:$20 sps:$4 sm:$0xff]   ;;  %v5405_v2 = vsub.s32 2, %v5392_v57 }
 0x140   :  { %v225_v5 = vpop.f32.mrf.mxu0 }
 0x141   :  { %v229_v6 = vmul.f32 0.01, %v224_v4  ;;  %v230_v7 = vmax.f32 %v222_v1, %v228_v3  ;;  %v303_v1 = vrot.slane %v298_v63, %v5395_v58  ;;  %v307_v3 = vrot.slane %v298_v63, %v5398_v60 }
 0x142   :  { %v226_v8 = vpop.f32.mrf.mxu0 }
 0x143   :  { %v231_v9 = vmax.f32 %v224_v4, %v229_v6  ;;  %v232_v13 = vpack.c.bf16 %v230_v7, %v230_v7  ;;  %v311_v7 = vrot.slane %v298_v63, %v5405_v2  ;;  %v5022_v63 = vld [vmem:[#allocation11 + $0x240] ss:$20 sps:$4 sm:$0xff]  }
 0x145   :  { %v233_v10 = vpack.c.bf16 %v231_v9, %v231_v9 }
 0x147   :  { %603 = vmatprep.mubr.bf16.mxu1 %v233_v10  ;;  %644 = vmatprep.mubr.bf16.mxu0 %v233_v10 }
 0x148   :  { %604 = vmatmul.mubr.bf16.vlgmr.msra.gmra.mxu1 %v232_v13  ;;  %645 = vmatmul.mubr.bf16.vlgmr.msra.gmra.mxu0 %v232_v13 }
 0x149   :  { %1457 = vmatpush1.bf16.msra.mxu0 %v4897_v11  ;;  %1498 = vmatpush1.bf16.msra.mxu1 %v4924_v12 }
 0x14a   :  { %1458 = vmatprep.subr.bf16.mxu0 %v4902_v14  ;;  %1499 = vmatprep.subr.bf16.mxu1 %v4932_v15 }
 0x14b   :  { %1529 = vmatprep.mubr.bf16.mxu1 %v5310_v0 }
 0x14d   :  { %1459 = vmatpush1.bf16.msra.mxu0 %v4900_v16  ;;  %1500 = vmatpush1.bf16.msra.mxu1 %v4930_v17 }
 0x14e   :  { %1460 = vmatprep.subr.bf16.mxu0 %v4905_v18  ;;  %1501 = vmatprep.subr.bf16.mxu1 %v4938_v19 }
 0x151   :  { %1461 = vmatpush1.bf16.msra.mxu0 %v4903_v20  ;;  %1502 = vmatpush1.bf16.msra.mxu1 %v4936_v21 }
 0x152   :  { %1462 = vmatprep.subr.bf16.mxu0 %v4908_v22  ;;  %1503 = vmatprep.subr.bf16.mxu1 %v4944_v23 }
 0x155   :  { %1463 = vmatpush1.bf16.msra.mxu0 %v4906_v24  ;;  %1504 = vmatpush1.bf16.msra.mxu1 %v4942_v25  ;;  %v4969_v24 = vld [vmem:[#allocation11 + $0x3a0] ss:$20 sps:$4 sm:$0xff]  }
 0x156   :  { %1464 = vmatprep.subr.bf16.mxu0 %v4911_v26  ;;  %1505 = vmatprep.subr.bf16.mxu1 %v4950_v27  ;;  %v4972_v26 = vld [vmem:[#allocation11 + $0x120] ss:$20 sps:$4 sm:$0xff]  }
 0x159   :  { %1465 = vmatpush1.bf16.msra.mxu0 %v4909_v28  ;;  %1506 = vmatpush1.bf16.msra.mxu1 %v4948_v29  ;;  %v4977_v28 = vld [vmem:[#allocation11 + $0x37c] ss:$20 sps:$4 sm:$0xff]  }
 0x15a   :  { %1466 = vmatprep.subr.bf16.mxu0 %v4914_v30  ;;  %1507 = vmatprep.subr.bf16.mxu1 %v4956_v48  ;;  %v4980_v29 = vld [vmem:[#allocation11 + $0xfc] ss:$20 sps:$4 sm:$0xff]   ;;  %v4975_v30 = vld [vmem:[#allocation11 + $0x378] ss:$20 sps:$4 sm:$0xff]   ;;  %v5007_v48 = vld [vmem:[#allocation11 + $0x2b4] ss:$20 sps:$4 sm:$0xff]  }
 0x15d   :  { %1467 = vmatpush1.bf16.msra.mxu0 %v4912_v31  ;;  %1508 = vmatpush1.bf16.msra.mxu1 %v4954_v49  ;;  %v4978_v31 = vld [vmem:[#allocation11 + $0xf8] ss:$20 sps:$4 sm:$0xff]   ;;  %v5010_v49 = vld [vmem:[#allocation11 + $0x34] ss:$20 sps:$4 sm:$0xff]  }
 0x15e   :  { %1468 = vmatprep.subr.bf16.mxu0 %v4917_v32  ;;  %1509 = vmatprep.subr.bf16.mxu1 %v4962_v52  ;;  %v4983_v32 = vld [vmem:[#allocation11 + $0x354] ss:$20 sps:$4 sm:$0xff]   ;;  %v5013_v52 = vld [vmem:[#allocation11 + $0x28c] ss:$20 sps:$4 sm:$0xff]  }
 0x161   :  { %1469 = vmatpush1.bf16.msra.mxu0 %v4915_v33  ;;  %1510 = vmatpush1.bf16.msra.mxu1 %v4960_v53  ;;  %v4986_v33 = vld [vmem:[#allocation11 + $0xd4] ss:$20 sps:$4 sm:$0xff]   ;;  %v5016_v53 = vld [vmem:[#allocation11 + $0xc] ss:$20 sps:$4 sm:$0xff]  }
 0x162   :  { %1470 = vmatprep.subr.bf16.mxu0 %v4920_v34  ;;  %1511 = vmatprep.subr.bf16.mxu1 %v4968_v56  ;;  %v4981_v34 = vld [vmem:[#allocation11 + $0x350] ss:$20 sps:$4 sm:$0xff]   ;;  %v5017_v56 = vld [vmem:[#allocation11 + $0x268] ss:$20 sps:$4 sm:$0xff]  }
 0x165   :  { %1471 = vmatpush1.bf16.msra.mxu0 %v4918_v35  ;;  %1512 = vmatpush1.bf16.msra.mxu1 %v4966_v59  ;;  %v4984_v35 = vld [vmem:[#allocation11 + $0xd0] ss:$20 sps:$4 sm:$0xff]  }
 0x166   :  { %1472 = vmatprep.subr.bf16.mxu0 %v4923_v36  ;;  %1538 = vmatprep.subr.bf16.mxu1 %v4974_v62  ;;  %v4989_v36 = vld [vmem:[#allocation11 + $0x32c] ss:$20 sps:$4 sm:$0xff]   ;;  %v5020_v59 = vld [vmem:[#allocation11 + $0x264] ss:$20 sps:$4 sm:$0xff]  }
 0x167   :  { %v5018_v62 = vld [vmem:[#allocation11 + $0x260] ss:$20 sps:$4 sm:$0xff]  }
 0x169   :  { %1473 = vmatpush2.bf16.msra.mxu0 %v4921_v37  ;;  %v4992_v37 = vld [vmem:[#allocation11 + $0xac] ss:$20 sps:$4 sm:$0xff]  }
 0x16a   :  { %1474 = vmatprep.subr.bf16.mxu0 %v4929_v38  ;;  %v4987_v38 = vld [vmem:[#allocation11 + $0x328] ss:$20 sps:$4 sm:$0xff]  }
 0x16d   :  { %1475 = vmatpush2.bf16.msra.mxu0 %v4927_v39  ;;  %v4990_v39 = vld [vmem:[#allocation11 + $0xa8] ss:$20 sps:$4 sm:$0xff]  }
 0x16e   :  { %1476 = vmatprep.subr.bf16.mxu0 %v4935_v40  ;;  %v4995_v40 = vld [vmem:[#allocation11 + $0x304] ss:$20 sps:$4 sm:$0xff]  }
 0x171   :  { %1477 = vmatpush2.bf16.msra.mxu0 %v4933_v41  ;;  %v4998_v41 = vld [vmem:[#allocation11 + $0x84] ss:$20 sps:$4 sm:$0xff]  }
 0x172   :  { %1478 = vmatprep.subr.bf16.mxu0 %v4941_v42  ;;  %v4993_v42 = vld [vmem:[#allocation11 + $0x300] ss:$20 sps:$4 sm:$0xff]  }
 0x175   :  { %1479 = vmatpush2.bf16.msra.mxu0 %v4939_v43  ;;  %v4996_v43 = vld [vmem:[#allocation11 + $0x80] ss:$20 sps:$4 sm:$0xff]  }
 0x176   :  { %1480 = vmatprep.subr.bf16.mxu0 %v4947_v44  ;;  %v5001_v44 = vld [vmem:[#allocation11 + $0x2dc] ss:$20 sps:$4 sm:$0xff]  }
 0x179   :  { %1481 = vmatpush2.bf16.msra.mxu0 %v4945_v45  ;;  %v5004_v45 = vld [vmem:[#allocation11 + $0x5c] ss:$20 sps:$4 sm:$0xff]  }
 0x17a   :  { %1482 = vmatprep.subr.bf16.mxu0 %v4953_v46  ;;  %v4999_v46 = vld [vmem:[#allocation11 + $0x2d8] ss:$20 sps:$4 sm:$0xff]  }
 0x17d   :  { %1483 = vmatpush2.bf16.msra.mxu0 %v4951_v47  ;;  %v5002_v47 = vld [vmem:[#allocation11 + $0x58] ss:$20 sps:$4 sm:$0xff]  }
 0x17e   :  { %1484 = vmatprep.subr.bf16.mxu0 %v4959_v50  ;;  %v5005_v50 = vld [vmem:[#allocation11 + $0x2b0] ss:$20 sps:$4 sm:$0xff]  }
 0x181   :  { %1485 = vmatpush2.bf16.msra.mxu0 %v4957_v51  ;;  %v5008_v51 = vld [vmem:[#allocation11 + $0x30] ss:$20 sps:$4 sm:$0xff]  }
 0x182   :  { %1486 = vmatprep.subr.bf16.mxu0 %v4965_v54  ;;  %v5011_v54 = vld [vmem:[#allocation11 + $0x288] ss:$20 sps:$4 sm:$0xff]  }
 0x185   :  { %1487 = vmatpush2.bf16.msra.mxu0 %v4963_v55  ;;  %v5014_v55 = vld [vmem:[#allocation11 + $0x8] ss:$20 sps:$4 sm:$0xff]  }
 0x186   :  { %1579 = vmatprep.subr.bf16.mxu0 %v4971_v61  ;;  %v5021_v61 = vld [vmem:[#allocation11 + $0x128] ss:$20 sps:$4 sm:$0xff]  }
 0x208   :  { %v605_v4 = vpop.f32.mrf.mxu1  ;;  %v4749_v5 = vpop.f32.mrf.mxu0 }
 0x209   :  { %v606_v6 = vadd.f32 %v605_v4, %v303_v1  ;;  %v5025_v1 = vld [vmem:[#allocation11 + $0x23c] ss:$20 sps:$4 sm:$0xff]   ;;  %v5023_v4 = vld [vmem:[#allocation11 + $0x238] ss:$20 sps:$4 sm:$0xff]  }
 0x20a   :  { %v607_v8 = vpop.f32.mrf.mxu1  ;;  %v4750_v9 = vpop.f32.mrf.mxu0 }
 0x20b   :  { %v652_v10 = vmul.f32 0.01, %v606_v6  ;;  %v608_v11 = vadd.f32 %v607_v8, %v307_v3  ;;  %v4751_v12 = vadd.f32 %v4750_v9, %v4749_v5  ;;  %v5026_v3 = vld [vmem:[#allocation11 + $0x100] ss:$20 sps:$4 sm:$0xff]   ;;  %v5027_v5 = vld [vmem:[#allocation11 + $0x218] ss:$20 sps:$4 sm:$0xff]  }
 0x20c   :  { %v609_v13 = vpop.f32.mrf.mxu1  ;;  %v4752_v14 = vpop.f32.mrf.mxu0  ;;  %v5028_v8 = vld [vmem:[#allocation11 + $0x210] ss:$20 sps:$4 sm:$0xff]  }
 0x20d   :  { %v653_v15 = vmul.f32 0.01, %v608_v11  ;;  %v647_v16 = vadd.f32 %v4751_v12, %v311_v7  ;;  %v655_v17 = vmax.f32 %v606_v6, %v652_v10  ;;  %v5030_v6 = vld [vmem:[#allocation11 + $0x214] ss:$20 sps:$4 sm:$0xff]   ;;  %v5031_v7 = vld [vmem:[#allocation11 + $0xd8] ss:$20 sps:$4 sm:$0xff]  }
 0x20e   :  { %v610_v18 = vpop.f32.mrf.mxu1  ;;  %v4753_v19 = vpop.f32.mrf.mxu0  ;;  %v5032_v9 = vld [vmem:[#allocation11 + $0x1f0] ss:$20 sps:$4 sm:$0xff]   ;;  %v5035_v10 = vld [vmem:[#allocation11 + $0x1ec] ss:$20 sps:$4 sm:$0xff]   ;;  %v5033_v12 = vld [vmem:[#allocation11 + $0x1e8] ss:$20 sps:$4 sm:$0xff]  }
 0x20f   :  { %v656_v20 = vmax.f32 %v608_v11, %v653_v15  ;;  %v654_v21 = vmul.f32 0.01, %v647_v16  ;;  %v5411_v25 = vpack.c.bf16 %v655_v17, %v655_v17  ;;  %v5036_v11 = vld [vmem:[#allocation11 + $0xb0] ss:$20 sps:$4 sm:$0xff]   ;;  %v5037_v13 = vld [vmem:[#allocation11 + $0x1c8] ss:$20 sps:$4 sm:$0xff]  }
 0x210   :  { %v5040_v14 = vld [vmem:[#allocation11 + $0x1c4] ss:$20 sps:$4 sm:$0xff]   ;;  %v5041_v15 = vld [vmem:[#allocation11 + $0x88] ss:$20 sps:$4 sm:$0xff]   ;;  %v5042_v17 = vld [vmem:[#allocation11 + $0x1a0] ss:$20 sps:$4 sm:$0xff]  }
 0x211   :  { %v5409_v22 = vpack.c.bf16 %v656_v20, %v656_v20  ;;  %v657_v23 = vmax.f32 %v647_v16, %v654_v21  ;;  %v5038_v16 = vld [vmem:[#allocation11 + $0x1c0] ss:$20 sps:$4 sm:$0xff]   ;;  %v5045_v18 = vld [vmem:[#allocation11 + $0x19c] ss:$20 sps:$4 sm:$0xff]   ;;  %v5043_v20 = vld [vmem:[#allocation11 + $0x198] ss:$20 sps:$4 sm:$0xff]  }
 0x212   :  { %v5046_v19 = vld [vmem:[#allocation11 + $0x60] ss:$20 sps:$4 sm:$0xff]   ;;  %v5047_v21 = vld [vmem:[#allocation11 + $0x178] ss:$20 sps:$4 sm:$0xff]  }
 0x213   :  { %v5413_v27 = vpack.c.bf16 %v657_v23, %v657_v23  ;;  %1488 = vmatprep.mubr.bf16.mxu0 %v5409_v22  ;;  %v5051_v23 = vld [vmem:[#allocation11 + $0x38] ss:$20 sps:$4 sm:$0xff]  }
 0x214   :  { %1489 = vmatmul.mubr.bf16.vlgmr.msra.gmra.mxu0 %v5411_v25 }
 0x215   :  { %1580 = vmatpush1.bf16.msra.mxu0 %v4969_v24  ;;  %1530 = vmatmul.mubr.bf16.vlgmr.msra.gmra.mxu1 %v5413_v27  ;;  %v5048_v24 = vld [vmem:[#allocation11 + $0x170] ss:$20 sps:$4 sm:$0xff]  }
 0x216   :  { %1539 = vmatpush1.bf16.msra.mxu1 %v4972_v26  ;;  %1570 = vmatprep.mubr.bf16.mxu1 %v5409_v22  ;;  %v5052_v26 = vld [vmem:[#allocation11 + $0x150] ss:$20 sps:$4 sm:$0xff]  }
 0x217   :  { %1581 = vmatprep.subr.bf16.mxu0 %v4977_v28  ;;  %1540 = vmatprep.subr.bf16.mxu1 %v4980_v29  ;;  %v5055_v28 = vld [vmem:[#allocation11 + $0x14c] ss:$20 sps:$4 sm:$0xff]  }
 0x218   :  { %1611 = vmatprep.mubr.bf16.mxu0 %v5310_v0  ;;  %v1771_v29 = vld [vmem:[#allocation14 + $0x1c0] sm:$0xff] }
 0x219   :  { %1582 = vmatpush1.bf16.msra.mxu0 %v4975_v30  ;;  %v1775_v30 = vld [vmem:[#allocation14 + $0x1e0] sm:$0xff] }
 0x21a   :  { %1541 = vmatpush1.bf16.msra.mxu1 %v4978_v31  ;;  %1583 = vmatprep.subr.bf16.mxu0 %v4983_v32  ;;  %v5056_v31 = vld [vmem:[#allocation11 + $0x10] ss:$20 sps:$4 sm:$0xff]   ;;  %v5053_v32 = vld [vmem:[#allocation11 + $0x148] ss:$20 sps:$4 sm:$0xff]  }
 0x21b   :  { %1542 = vmatprep.subr.bf16.mxu1 %v4986_v33  ;;  %v4462_v33 = vcombine.high %v1771_v29, %v1775_v30 }
 0x21d   :  { %1584 = vmatpush1.bf16.msra.mxu0 %v4981_v34  ;;  %v1763_v34 = vld [vmem:[#allocation14 + $0x180] sm:$0xff] }
 0x21e   :  { %1543 = vmatpush1.bf16.msra.mxu1 %v4984_v35  ;;  %1585 = vmatprep.subr.bf16.mxu0 %v4989_v36  ;;  %v1767_v35 = vld [vmem:[#allocation14 + $0x1a0] sm:$0xff]  ;;  %v4461_v36 = vcombine.low %v1771_v29, %v1775_v30 }
 0x21f   :  { %1544 = vmatprep.subr.bf16.mxu1 %v4992_v37  ;;  %v5057_v37 = vld [vmem:[#allocation11 + $0x3a8] ss:$20 sps:$4 sm:$0xff]  }
 0x220   :  { %v1883_v30 = vld [vmem:[#allocation14 + $0x540] sm:$0xff] }
 0x221   :  { %1586 = vmatpush1.bf16.msra.mxu0 %v4987_v38  ;;  %v5311_v38 = vmov 0.0  }
 0x222   :  { %1545 = vmatpush1.bf16.msra.mxu1 %v4990_v39  ;;  %1587 = vmatprep.subr.bf16.mxu0 %v4995_v40  ;;  %v4454_v39 = vcombine.high %v1763_v34, %v1767_v35  ;;  %v1755_v40 = vld [vmem:[#allocation14 + $0x140] sm:$0xff] }
 0x223   :  { %1546 = vmatprep.subr.bf16.mxu1 %v4998_v41  ;;  %v1759_v41 = vld [vmem:[#allocation14 + $0x160] sm:$0xff] }
 0x225   :  { %1588 = vmatpush1.bf16.msra.mxu0 %v4993_v42  ;;  %v4453_v42 = vcombine.low %v1763_v34, %v1767_v35  ;;  %v1811_v35 = vld [vmem:[#allocation14 + $0x300] sm:$0xff] }
 0x226   :  { %1547 = vmatpush1.bf16.msra.mxu1 %v4996_v43  ;;  %1589 = vmatprep.subr.bf16.mxu0 %v5001_v44  ;;  %v5058_v43 = vld [vmem:[#allocation11 + $0x380] ss:$20 sps:$4 sm:$0xff]   ;;  %v4446_v44 = vcombine.high %v1755_v40, %v1759_v41 }
 0x227   :  { %1548 = vmatprep.subr.bf16.mxu1 %v5004_v45  ;;  %v1747_v45 = vld [vmem:[#allocation14 + $0x100] sm:$0xff] }
 0x229   :  { %1590 = vmatpush1.bf16.msra.mxu0 %v4999_v46  ;;  %v1751_v46 = vld [vmem:[#allocation14 + $0x120] sm:$0xff] }
 0x22a   :  { %1549 = vmatpush1.bf16.msra.mxu1 %v5002_v47  ;;  %1591 = vmatprep.subr.bf16.mxu0 %v5007_v48  ;;  %v4445_v47 = vcombine.low %v1755_v40, %v1759_v41  ;;  %v5059_v48 = vld [vmem:[#allocation11 + $0x358] ss:$20 sps:$4 sm:$0xff]  }
 0x22b   :  { %1550 = vmatprep.subr.bf16.mxu1 %v5010_v49  ;;  %v4438_v49 = vcombine.high %v1747_v45, %v1751_v46 }
 0x22d   :  { %1592 = vmatpush1.bf16.msra.mxu0 %v5005_v50  ;;  %v1743_v50 = vld [vmem:[#allocation14 + $0xe0] sm:$0xff] }
 0x22e   :  { %1551 = vmatpush1.bf16.msra.mxu1 %v5008_v51  ;;  %1593 = vmatprep.subr.bf16.mxu0 %v5013_v52  ;;  %v4437_v51 = vcombine.low %v1747_v45, %v1751_v46  ;;  %v5060_v52 = vld [vmem:[#allocation11 + $0x330] ss:$20 sps:$4 sm:$0xff]  }
 0x22f   :  { %1552 = vmatprep.subr.bf16.mxu1 %v5016_v53  ;;  %v1867_v45 = vld [vmem:[#allocation14 + $0x4c0] sm:$0xff] }
 0x230   :  { %v1871_v46 = vld [vmem:[#allocation14 + $0x4e0] sm:$0xff] }
 0x231   :  { %1594 = vmatpush1.bf16.msra.mxu0 %v5011_v54  ;;  %v1731_v54 = vld [vmem:[#allocation14 + $0x80] sm:$0xff] }
 0x232   :  { %1553 = vmatpush1.bf16.msra.mxu1 %v5014_v55  ;;  %4755 = vmatprep.subr.bf16.mxu0 %v5017_v56  ;;  %v1735_v55 = vld [vmem:[#allocation14 + $0xa0] sm:$0xff] }
 0x233   :  { %1554 = vmatprep.subr.bf16.mxu1 %v5020_v59  ;;  %v5061_v59 = vld [vmem:[#allocation11 + $0x308] ss:$20 sps:$4 sm:$0xff]  }
 0x234   :  { %1612 = vmatmul.mubr.bf16.vlgmr.msra.gmra.mxu0 %v5413_v27 }
 0x235   :  { %4756 = vmatpush3.bf16.msra.mxu0 %v5021_v61  ;;  %1652 = vmatprep.mubr.bf16.mxu0 %v5409_v22  ;;  %v5050_v22 = vld [vmem:[#allocation11 + $0x174] ss:$20 sps:$4 sm:$0xff]   ;;  %v4422_v61 = vcombine.high %v1731_v54, %v1735_v55 }
 0x236   :  { %1555 = vmatpush2.bf16.msra.mxu1 %v5018_v62  ;;  %4757 = vmatprep.subr.bf16.mxu0 %v5022_v63  ;;  %v1723_v62 = vld [vmem:[#allocation14 + $0x40] sm:$0xff] }
 0x237   :  { %1556 = vmatprep.subr.bf16.mxu1 %v5025_v1  ;;  %v1727_v63 = vld [vmem:[#allocation14 + $0x60] sm:$0xff]  ;;  %v4421_v1 = vcombine.low %v1731_v54, %v1735_v55 }
 0x239   :  { %4758 = vmatpush3.bf16.msra.mxu0 %v5026_v3  ;;  %v5062_v3 = vld [vmem:[#allocation11 + $0x2e0] ss:$20 sps:$4 sm:$0xff]  }
 0x23a   :  { %1557 = vmatpush2.bf16.msra.mxu1 %v5023_v4  ;;  %4759 = vmatprep.subr.bf16.mxu0 %v5027_v5  ;;  %v4414_v4 = vcombine.high %v1723_v62, %v1727_v63  ;;  %v1715_v5 = vld [vmem:[#allocation14] sm:$0xff] }
 0x23b   :  { %1558 = vmatprep.subr.bf16.mxu1 %v5030_v6  ;;  %v1719_v6 = vld [vmem:[#allocation14 + $0x20] sm:$0xff] }
 0x23d   :  { %4760 = vmatpush3.bf16.msra.mxu0 %v5031_v7  ;;  %v4413_v7 = vcombine.low %v1723_v62, %v1727_v63  ;;  %v1851_v63 = vld [vmem:[#allocation14 + $0x440] sm:$0xff] }
 0x23e   :  { %1559 = vmatpush2.bf16.msra.mxu1 %v5028_v8  ;;  %4761 = vmatprep.subr.bf16.mxu0 %v5032_v9  ;;  %v5063_v8 = vld [vmem:[#allocation11 + $0x2b8] ss:$20 sps:$4 sm:$0xff]   ;;  %v4406_v9 = vcombine.high %v1715_v5, %v1719_v6 }
 0x23f   :  { %1560 = vmatprep.subr.bf16.mxu1 %v5035_v10  ;;  %v1835_v10 = vld [vmem:[#allocation14 + $0x3c0] sm:$0xff] }
 0x241   :  { %4762 = vmatpush3.bf16.msra.mxu0 %v5036_v11  ;;  %v1839_v11 = vld [vmem:[#allocation14 + $0x3e0] sm:$0xff] }
 0x242   :  { %1561 = vmatpush2.bf16.msra.mxu1 %v5033_v12  ;;  %4763 = vmatprep.subr.bf16.mxu0 %v5037_v13  ;;  %v1899_v12 = vld [vmem:[#allocation14 + $0x5c0] sm:$0xff] }
 0x243   :  { %1562 = vmatprep.subr.bf16.mxu1 %v5040_v14  ;;  %v1903_v13 = vld [vmem:[#allocation14 + $0x5e0] sm:$0xff]  ;;  %v4405_v14 = vcombine.low %v1715_v5, %v1719_v6 }
 0x244   :  { %v1779_v6 = vld [vmem:[#allocation14 + $0x200] sm:$0xff] }
 0x245   :  { %4764 = vmatpush3.bf16.msra.mxu0 %v5041_v15  ;;  %v5064_v15 = vld [vmem:[#allocation11 + $0x290] ss:$20 sps:$4 sm:$0xff]  }
 0x246   :  { %1563 = vmatpush2.bf16.msra.mxu1 %v5038_v16  ;;  %4765 = vmatprep.subr.bf16.mxu0 %v5042_v17  ;;  %v4526_v16 = vcombine.high %v1835_v10, %v1839_v11  ;;  %v1827_v17 = vld [vmem:[#allocation14 + $0x380] sm:$0xff] }
 0x247   :  { %1564 = vmatprep.subr.bf16.mxu1 %v5045_v18  ;;  %v1831_v18 = vld [vmem:[#allocation14 + $0x3a0] sm:$0xff] }
 0x249   :  { %4766 = vmatpush3.bf16.msra.mxu0 %v5046_v19  ;;  %v4590_v19 = vcombine.high %v1899_v12, %v1903_v13 }
 0x24a   :  { %1565 = vmatpush2.bf16.msra.mxu1 %v5043_v20  ;;  %4767 = vmatprep.subr.bf16.mxu0 %v5047_v21  ;;  %v1891_v20 = vld [vmem:[#allocation14 + $0x580] sm:$0xff] }
 0x24b   :  { %1566 = vmatprep.subr.bf16.mxu1 %v5050_v22  ;;  %v1895_v21 = vld [vmem:[#allocation14 + $0x5a0] sm:$0xff]  ;;  %v4525_v22 = vcombine.low %v1835_v10, %v1839_v11 }
 0x24c   :  { %v4582_v29 = vcombine.high %v1891_v20, %v1895_v21  ;;  %v4581_v34 = vcombine.low %v1891_v20, %v1895_v21  ;;  %v1847_v10 = vld [vmem:[#allocation14 + $0x420] sm:$0xff] }
 0x24d   :  { %4768 = vmatpush3.bf16.msra.mxu0 %v5051_v23  ;;  %v4518_v23 = vcombine.high %v1827_v17, %v1831_v18  ;;  %v1955_v20 = vld [vmem:[#allocation14 + $0x780] sm:$0xff] }
 0x24e   :  { %1567 = vmatpush2.bf16.msra.mxu1 %v5048_v24  ;;  %4769 = vmatprep.subr.bf16.mxu0 %v5052_v26  ;;  %v4589_v24 = vcombine.low %v1899_v12, %v1903_v13  ;;  %v1819_v26 = vld [vmem:[#allocation14 + $0x340] sm:$0xff] }
 0x24f   :  { %1568 = vmatprep.subr.bf16.mxu1 %v5055_v28  ;;  %v1823_v28 = vld [vmem:[#allocation14 + $0x360] sm:$0xff] }
 0x250   :  { %v4509_v40 = vcombine.low %v1819_v26, %v1823_v28  ;;  %v1959_v21 = vld [vmem:[#allocation14 + $0x7a0] sm:$0xff] }
 0x251   :  { %4770 = vmatpush3.bf16.msra.mxu0 %v5056_v31  ;;  %v1887_v31 = vld [vmem:[#allocation14 + $0x560] sm:$0xff] }
 0x252   :  { %1569 = vmatpush2.bf16.msra.mxu1 %v5053_v32  ;;  %3677 = vmatprep.subr.bf16.mxu0 %v4462_v33  ;;  %v4517_v32 = vcombine.low %v1827_v17, %v1831_v18  ;;  %v4510_v33 = vcombine.high %v1819_v26, %v1823_v28  ;;  %v1951_v26 = vld [vmem:[#allocation14 + $0x760] sm:$0xff]  ;;  %v4645_v28 = vcombine.low %v1955_v20, %v1959_v21 }
 0x253   :  { %4786 = vmatprep.subr.bf16.mxu1 %v5311_v38 }
 0x254   :  { %1653 = vmatmul.mubr.bf16.vlgmr.msra.gmra.mxu0 %v5411_v25 }
 0x255   :  { %1571 = vmatmul.mubr.bf16.vlgmr.msra.gmra.mxu1 %v5411_v25  ;;  %3678 = vmatpush1.bf16.msra.mxu0 %v4461_v36  ;;  %v1739_v25 = vld [vmem:[#allocation14 + $0xc0] sm:$0xff] }
 0x256   :  { %4787 = vmatpush3.bf16.msra.mxu1 %v5057_v37  ;;  %4802 = vmatprep.mubr.msk.bf16.mxu1 %vm5312_vm1, %v5311_v38  ;;  %v4430_v53 = vcombine.high %v1739_v25, %v1743_v50  ;;  %v4429_v56 = vcombine.low %v1739_v25, %v1743_v50  ;;  %v1815_v36 = vld [vmem:[#allocation14 + $0x320] sm:$0xff]  ;;  %v4574_v37 = vcombine.high %v1883_v30, %v1887_v31 }
 0x257   :  { %4788 = vmatprep.subr.bf16.mxu1 %v5311_v38  ;;  %3679 = vmatprep.subr.bf16.mxu0 %v4454_v39  ;;  %v1879_v39 = vld [vmem:[#allocation14 + $0x520] sm:$0xff]  ;;  %v4502_v41 = vcombine.high %v1811_v35, %v1815_v36 }
 0x258   :  { %v1795_v25 = vld [vmem:[#allocation14 + $0x280] sm:$0xff] }
 0x259   :  { %3680 = vmatpush1.bf16.msra.mxu0 %v4453_v42  ;;  %v4573_v42 = vcombine.low %v1883_v30, %v1887_v31  ;;  %v1799_v50 = vld [vmem:[#allocation14 + $0x2a0] sm:$0xff] }
 0x25a   :  { %4789 = vmatpush3.bf16.msra.mxu1 %v5058_v43  ;;  %3681 = vmatprep.subr.bf16.mxu0 %v4446_v44  ;;  %v1803_v43 = vld [vmem:[#allocation14 + $0x2c0] sm:$0xff]  ;;  %v4486_v55 = vcombine.high %v1795_v25, %v1799_v50 }
 0x25b   :  { %4790 = vmatprep.subr.bf16.mxu1 %v5311_v38  ;;  %v1939_v30 = vld [vmem:[#allocation14 + $0x700] sm:$0xff] }
 0x25c   :  { %v1943_v31 = vld [vmem:[#allocation14 + $0x720] sm:$0xff] }
 0x25d   :  { %3682 = vmatpush1.bf16.msra.mxu0 %v4445_v47  ;;  %v4501_v47 = vcombine.low %v1811_v35, %v1815_v36  ;;  %v4630_v35 = vcombine.high %v1939_v30, %v1943_v31 }
 0x25e   :  { %4791 = vmatpush3.bf16.msra.mxu1 %v5059_v48  ;;  %3683 = vmatprep.subr.bf16.mxu0 %v4438_v49 }
 0x25f   :  { %4792 = vmatprep.subr.bf16.mxu1 %v5311_v38 }
 0x261   :  { %3684 = vmatpush1.bf16.msra.mxu0 %v4437_v51  ;;  %v4558_v51 = vcombine.high %v1867_v45, %v1871_v46 }
 0x262   :  { %4793 = vmatpush3.bf16.msra.mxu1 %v5060_v52  ;;  %3685 = vmatprep.subr.bf16.mxu0 %v4430_v53  ;;  %v1859_v52 = vld [vmem:[#allocation14 + $0x480] sm:$0xff] }
 0x263   :  { %4794 = vmatprep.subr.bf16.mxu1 %v5311_v38  ;;  %v1863_v53 = vld [vmem:[#allocation14 + $0x4a0] sm:$0xff] }
 0x264   :  { %v4550_v62 = vcombine.high %v1859_v52, %v1863_v53  ;;  %v4549_v5 = vcombine.low %v1859_v52, %v1863_v53  ;;  %v1911_v52 = vld [vmem:[#allocation14 + $0x620] sm:$0xff] }
 0x265   :  { %3686 = vmatpush1.bf16.msra.mxu0 %v4429_v56  ;;  %v4557_v56 = vcombine.low %v1867_v45, %v1871_v46 }
 0x266   :  { %4795 = vmatpush3.bf16.msra.mxu1 %v5061_v59  ;;  %3687 = vmatprep.subr.bf16.mxu0 %v4422_v61  ;;  %v1787_v59 = vld [vmem:[#allocation14 + $0x240] sm:$0xff] }
 0x267   :  { %4796 = vmatprep.subr.bf16.mxu1 %v5311_v38  ;;  %v1791_v61 = vld [vmem:[#allocation14 + $0x260] sm:$0xff] }
 0x268   :  { %v4477_v11 = vcombine.low %v1787_v59, %v1791_v61 }
 0x269   :  { %3688 = vmatpush1.bf16.msra.mxu0 %v4421_v1  ;;  %v1855_v1 = vld [vmem:[#allocation14 + $0x460] sm:$0xff] }
 0x26a   :  { %4797 = vmatpush3.bf16.msra.mxu1 %v5062_v3  ;;  %3689 = vmatprep.subr.bf16.mxu0 %v4414_v4  ;;  %v4485_v3 = vcombine.low %v1795_v25, %v1799_v50  ;;  %v4478_v4 = vcombine.high %v1787_v59, %v1791_v61  ;;  %v4541_v13 = vcombine.low %v1851_v63, %v1855_v1  ;;  %v5450_v59 = vld [vmem:[#allocation13] sm:$0x1f] }
 0x26b   :  { %4798 = vmatprep.subr.bf16.mxu1 %v5311_v38  ;;  %v810_v61 = vrot.slane %v5450_v59, %v5395_v58 }
 0x26d   :  { %3690 = vmatpush1.bf16.msra.mxu0 %v4413_v7  ;;  %v1783_v7 = vld [vmem:[#allocation14 + $0x220] sm:$0xff] }
 0x26e   :  { %4799 = vmatpush3.bf16.msra.mxu1 %v5063_v8  ;;  %3691 = vmatprep.subr.bf16.mxu0 %v4406_v9  ;;  %v4542_v8 = vcombine.high %v1851_v63, %v1855_v1  ;;  %v1843_v9 = vld [vmem:[#allocation14 + $0x400] sm:$0xff]  ;;  %v4470_v12 = vcombine.high %v1779_v6, %v1783_v7  ;;  %v4469_v17 = vcombine.low %v1779_v6, %v1783_v7 }
 0x26f   :  { %4800 = vmatprep.subr.bf16.mxu1 %v5311_v38  ;;  %v1875_v38 = vld [vmem:[#allocation14 + $0x500] sm:$0xff]  ;;  %v4533_v18 = vcombine.low %v1843_v9, %v1847_v10 }
 0x270   :  { %v4566_v44 = vcombine.high %v1875_v38, %v1879_v39  ;;  %v4565_v49 = vcombine.low %v1875_v38, %v1879_v39  ;;  %v1935_v38 = vld [vmem:[#allocation14 + $0x6e0] sm:$0xff] }
 0x271   :  { %3692 = vmatpush1.bf16.msra.mxu0 %v4405_v14  ;;  %v4534_v14 = vcombine.high %v1843_v9, %v1847_v10 }
 0x272   :  { %4801 = vmatpush3.bf16.msra.mxu1 %v5064_v15  ;;  %3693 = vmatprep.subr.bf16.mxu0 %v4526_v16  ;;  %v1963_v15 = vld [vmem:[#allocation14 + $0x7c0] sm:$0xff] }
 0x273   :  { %3718 = vmatprep.subr.bf16.mxu1 %v4590_v19  ;;  %v1967_v16 = vld [vmem:[#allocation14 + $0x7e0] sm:$0xff] }
 0x274   :  { %v4654_v19 = vcombine.high %v1963_v15, %v1967_v16 }
 0x275   :  { %4803 = vmatmul.mubr.bf16.vlgmr.msra.gmra.mxu1 %v5413_v27  ;;  %3694 = vmatpush2.bf16.msra.mxu0 %v4525_v22  ;;  %v1807_v27 = vld [vmem:[#allocation14 + $0x2e0] sm:$0xff]  ;;  %v4653_v22 = vcombine.low %v1963_v15, %v1967_v16 }
 0x276   :  { %3695 = vmatprep.subr.bf16.mxu0 %v4518_v23  ;;  %3719 = vmatpush1.bf16.msra.mxu1 %v4589_v24  ;;  %v4494_v48 = vcombine.high %v1803_v43, %v1807_v27  ;;  %v4493_v54 = vcombine.low %v1803_v43, %v1807_v27  ;;  %v4646_v23 = vcombine.high %v1955_v20, %v1959_v21  ;;  %v1947_v24 = vld [vmem:[#allocation14 + $0x740] sm:$0xff]  ;;  %v5444_v43 = vld [vmem:[#allocation14 + $0x1e8] sm:$0xff] }
 0x277   :  { %3720 = vmatprep.subr.bf16.mxu1 %v4582_v29  ;;  %v4638_v29 = vcombine.high %v1947_v24, %v1951_v26  ;;  %v1923_v27 = vld [vmem:[#allocation14 + $0x680] sm:$0xff] }
 0x279   :  { %3696 = vmatpush2.bf16.msra.mxu0 %v4517_v32  ;;  %v4637_v32 = vcombine.low %v1947_v24, %v1951_v26 }
 0x27a   :  { %3697 = vmatprep.subr.bf16.mxu0 %v4510_v33  ;;  %3721 = vmatpush1.bf16.msra.mxu1 %v4581_v34  ;;  %v5434_v33 = vld [vmem:[#allocation14 + $0x9c0] sm:$0xff] }
 0x27b   :  { %3722 = vmatprep.subr.bf16.mxu1 %v4574_v37  ;;  %v5436_v34 = vld [vmem:[#allocation14 + $0x9e0] sm:$0xff] }
 0x27c   :  { %v4718_v36 = vcombine.high %v5434_v33, %v5436_v34  ;;  %v1931_v37 = vld [vmem:[#allocation14 + $0x6c0] sm:$0xff]  ;;  %v4717_v39 = vcombine.low %v5434_v33, %v5436_v34 }
 0x27d   :  { %3698 = vmatpush2.bf16.msra.mxu0 %v4509_v40  ;;  %v4629_v40 = vcombine.low %v1939_v30, %v1943_v31  ;;  %v4621_v46 = vcombine.low %v1931_v37, %v1935_v38  ;;  %v1999_v33 = vld [vmem:[#allocation14 + $0x8e0] sm:$0xff] }
 0x27e   :  { %3699 = vmatprep.subr.bf16.mxu0 %v4502_v41  ;;  %3723 = vmatpush1.bf16.msra.mxu1 %v4573_v42  ;;  %v4622_v41 = vcombine.high %v1931_v37, %v1935_v38  ;;  %v5442_v42 = vld [vmem:[#allocation14 + $0x1c8] sm:$0xff]  ;;  %v1991_v37 = vld [vmem:[#allocation14 + $0x8a0] sm:$0xff] }
 0x27f   :  { %3724 = vmatprep.subr.bf16.mxu1 %v4566_v44  ;;  %v1927_v44 = vld [vmem:[#allocation14 + $0x6a0] sm:$0xff]  ;;  %v4463_v45 = vcombine.low %v5442_v42, %v5444_v43 }
 0x280   :  { %v4613_v25 = vcombine.low %v1923_v27, %v1927_v44 }
 0x281   :  { %3700 = vmatpush2.bf16.msra.mxu0 %v4501_v47  ;;  %v4614_v47 = vcombine.high %v1923_v27, %v1927_v44 }
 0x282   :  { %3701 = vmatprep.subr.bf16.mxu0 %v4494_v48  ;;  %3725 = vmatpush1.bf16.msra.mxu1 %v4565_v49  ;;  %v1915_v48 = vld [vmem:[#allocation14 + $0x640] sm:$0xff] }
 0x283   :  { %3726 = vmatprep.subr.bf16.mxu1 %v4558_v51  ;;  %v1919_v49 = vld [vmem:[#allocation14 + $0x660] sm:$0xff] }
 0x284   :  { %v4606_v50 = vcombine.high %v1915_v48, %v1919_v49  ;;  %v1907_v51 = vld [vmem:[#allocation14 + $0x600] sm:$0xff]  ;;  %v4605_v53 = vcombine.low %v1915_v48, %v1919_v49 }
 0x285   :  { %3702 = vmatpush2.bf16.msra.mxu0 %v4493_v54  ;;  %v4598_v54 = vcombine.high %v1907_v51, %v1911_v52  ;;  %v1975_v48 = vld [vmem:[#allocation14 + $0x820] sm:$0xff] }
 0x286   :  { %3703 = vmatprep.subr.bf16.mxu0 %v4486_v55  ;;  %3727 = vmatpush1.bf16.msra.mxu1 %v4557_v56  ;;  %v4597_v55 = vcombine.low %v1907_v51, %v1911_v52  ;;  %v4464_v56 = vcombine.high %v5442_v42, %v5444_v43  ;;  %v5463_v52 = vld [vmem:[#allocation14 + $0x5c8] sm:$0xff] }
 0x287   :  { %3728 = vmatprep.subr.bf16.mxu1 %v4550_v62  ;;  %v814_v62 = vrot.slane %v5450_v59, %v5398_v60  ;;  %v1732_v43 = vld [vmem:[#allocation14 + $0x88] sm:$0xff] }
 0x289   :  { %3704 = vmatpush2.bf16.msra.mxu0 %v4485_v3 }
 0x28a   :  { %3705 = vmatprep.subr.bf16.mxu0 %v4478_v4  ;;  %3729 = vmatpush1.bf16.msra.mxu1 %v4549_v5 }
 0x28b   :  { %3730 = vmatprep.subr.bf16.mxu1 %v4542_v8 }
 0x28d   :  { %3706 = vmatpush2.bf16.msra.mxu0 %v4477_v11 }
 0x28e   :  { %3707 = vmatprep.subr.bf16.mxu0 %v4470_v12  ;;  %3731 = vmatpush1.bf16.msra.mxu1 %v4541_v13 }
 0x28f   :  { %3732 = vmatprep.subr.bf16.mxu1 %v4534_v14 }
 0x291   :  { %3708 = vmatpush2.bf16.msra.mxu0 %v4469_v17  ;;  %v2019_v17 = vld [vmem:[#allocation14 + $0x980] sm:$0xff] }
 0x292   :  { %3733 = vmatpush1.bf16.msra.mxu1 %v4533_v18  ;;  %3759 = vmatprep.subr.bf16.mxu0 %v4718_v36  ;;  %v2023_v18 = vld [vmem:[#allocation14 + $0x9a0] sm:$0xff] }
 0x293   :  { %3734 = vmatprep.subr.bf16.mxu1 %v4654_v19  ;;  %v4710_v21 = vcombine.high %v2019_v17, %v2023_v18  ;;  %v4709_v24 = vcombine.low %v2019_v17, %v2023_v18  ;;  %v1987_v36 = vld [vmem:[#allocation14 + $0x880] sm:$0xff]  ;;  %v1764_v18 = vld [vmem:[#allocation14 + $0x188] sm:$0xff] }
 0x294   :  { %v4677_v27 = vcombine.low %v1987_v36, %v1991_v37 }
 0x296   :  { %3735 = vmatpush2.bf16.msra.mxu1 %v4653_v22  ;;  %v2011_v22 = vld [vmem:[#allocation14 + $0x940] sm:$0xff] }
 0x297   :  { %3736 = vmatprep.subr.bf16.mxu1 %v4646_v23  ;;  %v2015_v23 = vld [vmem:[#allocation14 + $0x960] sm:$0xff] }
 0x298   :  { %v4702_v26 = vcombine.high %v2011_v22, %v2015_v23  ;;  %v4701_v30 = vcombine.low %v2011_v22, %v2015_v23 }
 0x29a   :  { %3737 = vmatpush2.bf16.msra.mxu1 %v4645_v28  ;;  %v2003_v28 = vld [vmem:[#allocation14 + $0x900] sm:$0xff] }
 0x29b   :  { %3738 = vmatprep.subr.bf16.mxu1 %v4638_v29  ;;  %v2007_v29 = vld [vmem:[#allocation14 + $0x920] sm:$0xff] }
 0x29c   :  { %v4694_v31 = vcombine.high %v2003_v28, %v2007_v29  ;;  %v4693_v34 = vcombine.low %v2003_v28, %v2007_v29  ;;  %v1760_v28 = vld [vmem:[#allocation14 + $0x168] sm:$0xff] }
 0x29e   :  { %3739 = vmatpush2.bf16.msra.mxu1 %v4637_v32  ;;  %v1995_v32 = vld [vmem:[#allocation14 + $0x8c0] sm:$0xff] }
 0x29f   :  { %3740 = vmatprep.subr.bf16.mxu1 %v4630_v35  ;;  %v4686_v35 = vcombine.high %v1995_v32, %v1999_v33  ;;  %v4685_v38 = vcombine.low %v1995_v32, %v1999_v33  ;;  %v1752_v32 = vld [vmem:[#allocation14 + $0x128] sm:$0xff] }
 0x2a2   :  { %3741 = vmatpush2.bf16.msra.mxu1 %v4629_v40  ;;  %v1979_v40 = vld [vmem:[#allocation14 + $0x840] sm:$0xff] }
 0x2a3   :  { %3742 = vmatprep.subr.bf16.mxu1 %v4622_v41  ;;  %v1983_v41 = vld [vmem:[#allocation14 + $0x860] sm:$0xff] }
 0x2a6   :  { %3743 = vmatpush2.bf16.msra.mxu1 %v4621_v46  ;;  %v4670_v46 = vcombine.high %v1979_v40, %v1983_v41 }
 0x2a7   :  { %3744 = vmatprep.subr.bf16.mxu1 %v4614_v47  ;;  %v1971_v47 = vld [vmem:[#allocation14 + $0x800] sm:$0xff] }
 0x2a8   :  { %v4662_v51 = vcombine.high %v1971_v47, %v1975_v48 }
 0x2aa   :  { %3745 = vmatpush2.bf16.msra.mxu1 %v4613_v25  ;;  %v4669_v25 = vcombine.low %v1979_v40, %v1983_v41 }
 0x2ab   :  { %3746 = vmatprep.subr.bf16.mxu1 %v4606_v50 }
 0x2ae   :  { %3747 = vmatpush2.bf16.msra.mxu1 %v4605_v53  ;;  %v5465_v53 = vld [vmem:[#allocation14 + $0x5e8] sm:$0xff] }
 0x2af   :  { %3748 = vmatprep.subr.bf16.mxu1 %v4598_v54 }
 0x2b2   :  { %3749 = vmatpush2.bf16.msra.mxu1 %v4597_v55  ;;  %v4661_v55 = vcombine.low %v1971_v47, %v1975_v48 }
 0x2b3   :  { %3800 = vmatprep.subr.bf16.mxu1 %v4464_v56  ;;  %v4592_v56 = vcombine.high %v5463_v52, %v5465_v53 }
 0x2d4   :  { %v1490_v63 = vpop.f32.mrf.mxu0 }
 0x2d5   :  { %v1491_v1 = vadd.f32 %v1490_v63, %v810_v61  ;;  %v1531_v3 = vpop.f32.mrf.mxu1  ;;  %v821_v61 = vsub.s32 3, %v5392_v57 }
 0x2d6   :  { %v1492_v4 = vpop.f32.mrf.mxu0 }
 0x2d7   :  { %v1532_v5 = vadd.f32 %v1531_v3, %v1491_v1  ;;  %v1493_v6 = vadd.f32 %v1492_v4, %v814_v62  ;;  %v1533_v7 = vpop.f32.mrf.mxu1  ;;  %v818_v62 = vrot.slane %v5450_v59, %v5405_v2  ;;  %v822_v1 = vrot.slane %v5450_v59, %v821_v61 }
 0x2d8   :  { %v1494_v8 = vpop.f32.mrf.mxu0 }
 0x2d9   :  { %v1700_v9 = vmul.f32 0.01, %v1532_v5  ;;  %v1534_v10 = vadd.f32 %v1533_v7, %v1493_v6  ;;  %v1535_v11 = vpop.f32.mrf.mxu1 }
 0x2da   :  { %v1495_v12 = vpop.f32.mrf.mxu0 }
 0x2db   :  { %v1701_v13 = vmul.f32 0.01, %v1534_v10  ;;  %v1536_v14 = vpop.f32.mrf.mxu1  ;;  %v1705_v15 = vmax.f32 %v1532_v5, %v1700_v9 }
 0x2dd   :  { %v1706_v16 = vmax.f32 %v1534_v10, %v1701_v13  ;;  %v5458_v20 = vpack.c.bf16 %v1705_v15, %v1705_v15 }
 0x2df   :  { %v5456_v19 = vpack.c.bf16 %v1706_v16, %v1706_v16 }
 0x2e1   :  { %3709 = vmatprep.mubr.bf16.mxu0 %v5456_v19 }
 0x2e2   :  { %3710 = vmatmul.mubr.bf16.vlgmr.msra.gmra.mxu0 %v5458_v20 }
 0x2e3   :  { %3760 = vmatpush1.bf16.msra.mxu0 %v4717_v39  ;;  %3791 = vmatprep.mubr.bf16.mxu0 %v5310_v0  ;;  %v4678_v39 = vcombine.high %v1987_v36, %v1991_v37  ;;  %v1744_v36 = vld [vmem:[#allocation14 + $0xe8] sm:$0xff] }
 0x2e4   :  { %3761 = vmatprep.subr.bf16.mxu0 %v4710_v21  ;;  %v1768_v21 = vld [vmem:[#allocation14 + $0x1a8] sm:$0xff] }
 0x2e5   :  { %v4455_v29 = vcombine.low %v1764_v18, %v1768_v21 }
 0x2e7   :  { %3762 = vmatpush1.bf16.msra.mxu0 %v4709_v24  ;;  %v4456_v24 = vcombine.high %v1764_v18, %v1768_v21  ;;  %v1876_v21 = vld [vmem:[#allocation14 + $0x508] sm:$0xff] }
 0x2e8   :  { %3763 = vmatprep.subr.bf16.mxu0 %v4702_v26  ;;  %v1756_v26 = vld [vmem:[#allocation14 + $0x148] sm:$0xff] }
 0x2e9   :  { %v4447_v33 = vcombine.low %v1756_v26, %v1760_v28 }
 0x2eb   :  { %3764 = vmatpush1.bf16.msra.mxu0 %v4701_v30  ;;  %v4448_v30 = vcombine.high %v1756_v26, %v1760_v28  ;;  %v1820_v26 = vld [vmem:[#allocation14 + $0x348] sm:$0xff] }
 0x2ec   :  { %3765 = vmatprep.subr.bf16.mxu0 %v4694_v31  ;;  %v1748_v31 = vld [vmem:[#allocation14 + $0x108] sm:$0xff] }
 0x2ed   :  { %v4439_v37 = vcombine.low %v1748_v31, %v1752_v32  ;;  %v1824_v28 = vld [vmem:[#allocation14 + $0x368] sm:$0xff] }
 0x2ef   :  { %3766 = vmatpush1.bf16.msra.mxu0 %v4693_v34  ;;  %v4440_v34 = vcombine.high %v1748_v31, %v1752_v32  ;;  %v4512_v32 = vcombine.high %v1820_v26, %v1824_v28 }
 0x2f0   :  { %3767 = vmatprep.subr.bf16.mxu0 %v4686_v35  ;;  %v1740_v35 = vld [vmem:[#allocation14 + $0xc8] sm:$0xff] }
 0x2f1   :  { %v4432_v42 = vcombine.high %v1740_v35, %v1744_v36  ;;  %v4431_v40 = vcombine.low %v1740_v35, %v1744_v36  ;;  %v1812_v35 = vld [vmem:[#allocation14 + $0x308] sm:$0xff] }
 0x2f2   :  { %v1816_v36 = vld [vmem:[#allocation14 + $0x328] sm:$0xff] }
 0x2f3   :  { %3768 = vmatpush1.bf16.msra.mxu0 %v4685_v38  ;;  %v825_v38 = vsub.s32 4, %v5392_v57 }
 0x2f4   :  { %v1613_v44 = vpop.f32.mrf.mxu0  ;;  %3769 = vmatprep.subr.bf16.mxu0 %v4678_v39 }
 0x2f5   :  { %v826_v41 = vrot.slane %v5450_v59, %v825_v38 }
 0x2f6   :  { %v1615_v49 = vpop.f32.mrf.mxu0 }
 0x2f7   :  { %3770 = vmatpush1.bf16.msra.mxu0 %v4677_v27 }
 0x2f8   :  { %v1617_v50 = vpop.f32.mrf.mxu0  ;;  %3771 = vmatprep.subr.bf16.mxu0 %v4670_v46  ;;  %v1728_v46 = vld [vmem:[#allocation14 + $0x68] sm:$0xff] }
 0x2fa   :  { %v1618_v54 = vpop.f32.mrf.mxu0 }
 0x2fb   :  { %3772 = vmatpush1.bf16.msra.mxu0 %v4669_v25  ;;  %v1720_v54 = vld [vmem:[#allocation14 + $0x28] sm:$0xff] }
 0x2fc   :  { %3773 = vmatprep.subr.bf16.mxu0 %v4662_v51  ;;  %v1716_v51 = vld [vmem:[#allocation14 + $0x8] sm:$0xff] }
 0x2fd   :  { %v4408_v59 = vcombine.high %v1716_v51, %v1720_v54 }
 0x2ff   :  { %3774 = vmatpush1.bf16.msra.mxu0 %v4661_v55 }
 0x300   :  { %3841 = vmatprep.subr.bf16.mxu0 %v4592_v56 }
 0x314   :  { %v4771_v63 = vpop.f32.mrf.mxu0 }
 0x315   :  { %v1572_v3 = vpop.f32.mrf.mxu1 }
 0x316   :  { %v1573_v4 = vadd.f32 %v1572_v3, %v818_v62  ;;  %v4772_v5 = vpop.f32.mrf.mxu0  ;;  %v1896_v3 = vld [vmem:[#allocation14 + $0x5a8] sm:$0xff] }
 0x317   :  { %v1574_v6 = vpop.f32.mrf.mxu1  ;;  %v4773_v39 = vadd.f32 %v4772_v5, %v4771_v63  ;;  %v1836_v5 = vld [vmem:[#allocation14 + $0x3c8] sm:$0xff] }
 0x318   :  { %v1614_v7 = vadd.f32 %v1613_v44, %v1573_v4  ;;  %v1575_v8 = vadd.f32 %v1574_v6, %v822_v1  ;;  %v4774_v9 = vpop.f32.mrf.mxu0  ;;  %v1724_v44 = vld [vmem:[#allocation14 + $0x48] sm:$0xff] }
 0x319   :  { %v1576_v10 = vpop.f32.mrf.mxu1  ;;  %v1655_v47 = vadd.f32 %v4773_v39, %v826_v41  ;;  %v4416_v25 = vcombine.high %v1724_v44, %v1728_v46  ;;  %v4415_v62 = vcombine.low %v1724_v44, %v1728_v46  ;;  %v1892_v1 = vld [vmem:[#allocation14 + $0x588] sm:$0xff]  ;;  %v4503_v46 = vcombine.low %v1812_v35, %v1816_v36 }
 0x31a   :  { %v1702_v11 = vmul.f32 0.01, %v1614_v7  ;;  %v1616_v12 = vadd.f32 %v1615_v49, %v1575_v8  ;;  %v4775_v13 = vpop.f32.mrf.mxu0  ;;  %v1840_v6 = vld [vmem:[#allocation14 + $0x3e8] sm:$0xff]  ;;  %v4591_v8 = vcombine.low %v5463_v52, %v5465_v53  ;;  %v4407_v10 = vcombine.low %v1716_v51, %v1720_v54 }
 0x31b   :  { %v1577_v14 = vpop.f32.mrf.mxu1  ;;  %v1884_v13 = vld [vmem:[#allocation14 + $0x548] sm:$0xff]  ;;  %v4527_v52 = vcombine.low %v1836_v5, %v1840_v6 }
 0x31c   :  { %v1703_v15 = vmul.f32 0.01, %v1616_v12  ;;  %v1707_v16 = vmax.f32 %v1614_v7, %v1702_v11  ;;  %v4584_v11 = vcombine.high %v1892_v1, %v1896_v3  ;;  %v1888_v14 = vld [vmem:[#allocation14 + $0x568] sm:$0xff] }
 0x31d   :  { %v4576_v53 = vcombine.high %v1884_v13, %v1888_v14  ;;  %v1860_v39 = vld [vmem:[#allocation14 + $0x488] sm:$0xff] }
 0x31e   :  { %v1708_v17 = vmax.f32 %v1616_v12, %v1703_v15  ;;  %v5477_v23 = vpack.c.bf16 %v1707_v16, %v1707_v16  ;;  %v4528_v12 = vcombine.high %v1836_v5, %v1840_v6  ;;  %v1828_v15 = vld [vmem:[#allocation14 + $0x388] sm:$0xff] }
 0x31f   :  { %v1832_v16 = vld [vmem:[#allocation14 + $0x3a8] sm:$0xff] }
 0x320   :  { %v5475_v22 = vpack.c.bf16 %v1708_v17, %v1708_v17  ;;  %v4583_v17 = vcombine.low %v1892_v1, %v1896_v3  ;;  %v4520_v18 = vcombine.high %v1828_v15, %v1832_v16  ;;  %v1804_v41 = vld [vmem:[#allocation14 + $0x2c8] sm:$0xff] }
 0x321   :  { %v1800_v51 = vld [vmem:[#allocation14 + $0x2a8] sm:$0xff] }
 0x322   :  { %3750 = vmatprep.mubr.bf16.mxu1 %v5475_v22  ;;  %v1788_v1 = vld [vmem:[#allocation14 + $0x248] sm:$0xff] }
 0x323   :  { %3751 = vmatmul.mubr.bf16.vlgmr.msra.gmra.mxu1 %v5477_v23  ;;  %v1792_v3 = vld [vmem:[#allocation14 + $0x268] sm:$0xff] }
 0x324   :  { %3801 = vmatpush1.bf16.msra.mxu1 %v4463_v45  ;;  %3832 = vmatprep.mubr.bf16.mxu1 %v5456_v19  ;;  %v1736_v45 = vld [vmem:[#allocation14 + $0xa8] sm:$0xff] }
 0x325   :  { %3802 = vmatprep.subr.bf16.mxu1 %v4456_v24  ;;  %v4424_v27 = vcombine.high %v1732_v43, %v1736_v45  ;;  %v4423_v48 = vcombine.low %v1732_v43, %v1736_v45  ;;  %v1880_v24 = vld [vmem:[#allocation14 + $0x528] sm:$0xff]  ;;  %v4504_v45 = vcombine.high %v1812_v35, %v1816_v36 }
 0x326   :  { %v4568_v31 = vcombine.high %v1876_v21, %v1880_v24 }
 0x328   :  { %3803 = vmatpush1.bf16.msra.mxu1 %v4455_v29  ;;  %v4575_v29 = vcombine.low %v1884_v13, %v1888_v14  ;;  %v4479_v14 = vcombine.low %v1788_v1, %v1792_v3 }
 0x329   :  { %3804 = vmatprep.subr.bf16.mxu1 %v4448_v30  ;;  %v4519_v30 = vcombine.low %v1828_v15, %v1832_v16 }
 0x32c   :  { %3805 = vmatpush1.bf16.msra.mxu1 %v4447_v33  ;;  %v1868_v33 = vld [vmem:[#allocation14 + $0x4c8] sm:$0xff] }
 0x32d   :  { %3806 = vmatprep.subr.bf16.mxu1 %v4440_v34  ;;  %v1872_v34 = vld [vmem:[#allocation14 + $0x4e8] sm:$0xff] }
 0x32e   :  { %v4560_v43 = vcombine.high %v1868_v33, %v1872_v34  ;;  %v4559_v44 = vcombine.low %v1868_v33, %v1872_v34 }
 0x330   :  { %3807 = vmatpush1.bf16.msra.mxu1 %v4439_v37  ;;  %v4567_v37 = vcombine.low %v1876_v21, %v1880_v24 }
 0x331   :  { %3808 = vmatprep.subr.bf16.mxu1 %v4432_v42  ;;  %v4511_v42 = vcombine.low %v1820_v26, %v1824_v28 }
 0x334   :  { %3809 = vmatpush1.bf16.msra.mxu1 %v4431_v40  ;;  %v1864_v40 = vld [vmem:[#allocation14 + $0x4a8] sm:$0xff] }
 0x335   :  { %v1694_v49 = vpop.f32.mrf.mxu1  ;;  %3810 = vmatprep.subr.bf16.mxu1 %v4424_v27  ;;  %v1808_v27 = vld [vmem:[#allocation14 + $0x2e8] sm:$0xff]  ;;  %v4551_v54 = vcombine.low %v1860_v39, %v1864_v40 }
 0x336   :  { %v1695_v50 = vadd.f32 %v1694_v49, %v1655_v47  ;;  %v4552_v47 = vcombine.high %v1860_v39, %v1864_v40  ;;  %v1852_v49 = vld [vmem:[#allocation14 + $0x448] sm:$0xff] }
 0x337   :  { %v4804_v55 = vpop.f32.mrf.mxu1 }
 0x338   :  { %v1704_v56 = vmul.f32 0.01, %v1695_v50  ;;  %3811 = vmatpush1.bf16.msra.mxu1 %v4423_v48  ;;  %v4496_v48 = vcombine.high %v1804_v41, %v1808_v27  ;;  %v4495_v55 = vcombine.low %v1804_v41, %v1808_v27 }
 0x339   :  { %v1697_v63 = vpop.f32.mrf.mxu1  ;;  %3812 = vmatprep.subr.bf16.mxu1 %v4416_v25  ;;  %v1856_v25 = vld [vmem:[#allocation14 + $0x468] sm:$0xff] }
 0x33a   :  { %v1709_v4 = vmax.f32 %v1695_v50, %v1704_v56  ;;  %v1796_v50 = vld [vmem:[#allocation14 + $0x288] sm:$0xff]  ;;  %v4544_v56 = vcombine.high %v1852_v49, %v1856_v25 }
 0x33b   :  { %v4805_v7 = vpop.f32.mrf.mxu1  ;;  %v1844_v63 = vld [vmem:[#allocation14 + $0x408] sm:$0xff]  ;;  %v4487_v5 = vcombine.low %v1796_v50, %v1800_v51 }
 0x33c   :  { %v5491_v9 = vpack.c.bf16 %v1709_v4, %v1709_v4  ;;  %3813 = vmatpush1.bf16.msra.mxu1 %v4415_v62  ;;  %v4488_v62 = vcombine.high %v1796_v50, %v1800_v51  ;;  %v4543_v4 = vcombine.low %v1852_v49, %v1856_v25  ;;  %v4480_v7 = vcombine.high %v1788_v1, %v1792_v3 }
 0x33d   :  { %3814 = vmatprep.subr.bf16.mxu1 %v4408_v59  ;;  %v1848_v59 = vld [vmem:[#allocation14 + $0x428] sm:$0xff] }
 0x33e   :  { %3792 = vmatmul.mubr.bf16.vlgmr.msra.gmra.mxu0 %v5491_v9  ;;  %v4536_v6 = vcombine.high %v1844_v63, %v1848_v59  ;;  %v4535_v13 = vcombine.low %v1844_v63, %v1848_v59 }
 0x33f   :  { %3842 = vmatpush1.bf16.msra.mxu0 %v4591_v8  ;;  %3873 = vmatprep.mubr.bf16.mxu0 %v5475_v22  ;;  %v1964_v8 = vld [vmem:[#allocation14 + $0x7c8] sm:$0xff] }
 0x340   :  { %3815 = vmatpush1.bf16.msra.mxu1 %v4407_v10  ;;  %3843 = vmatprep.subr.bf16.mxu0 %v4584_v11  ;;  %v1968_v10 = vld [vmem:[#allocation14 + $0x7e8] sm:$0xff] }
 0x341   :  { %3816 = vmatprep.subr.bf16.mxu1 %v4528_v12  ;;  %v1780_v11 = vld [vmem:[#allocation14 + $0x208] sm:$0xff]  ;;  %v4656_v15 = vcombine.high %v1964_v8, %v1968_v10  ;;  %v4655_v21 = vcombine.low %v1964_v8, %v1968_v10 }
 0x342   :  { %v1784_v12 = vld [vmem:[#allocation14 + $0x228] sm:$0xff] }
 0x343   :  { %3844 = vmatpush1.bf16.msra.mxu0 %v4583_v17  ;;  %v4472_v16 = vcombine.high %v1780_v11, %v1784_v12  ;;  %v1956_v17 = vld [vmem:[#allocation14 + $0x788] sm:$0xff]  ;;  %v4471_v24 = vcombine.low %v1780_v11, %v1784_v12 }
 0x344   :  { %3817 = vmatpush2.bf16.msra.mxu1 %v4527_v52  ;;  %3845 = vmatprep.subr.bf16.mxu0 %v4576_v53  ;;  %v1960_v52 = vld [vmem:[#allocation14 + $0x7a8] sm:$0xff] }
 0x345   :  { %3818 = vmatprep.subr.bf16.mxu1 %v4520_v18  ;;  %v2028_v53 = vld [vmem:[#allocation14 + $0x9c8] sm:$0xff]  ;;  %v4648_v26 = vcombine.high %v1956_v17, %v1960_v52  ;;  %v4647_v33 = vcombine.low %v1956_v17, %v1960_v52 }
 0x346   :  { %v2032_v18 = vld [vmem:[#allocation14 + $0x9e8] sm:$0xff] }
 0x347   :  { %3846 = vmatpush1.bf16.msra.mxu0 %v4575_v29  ;;  %v4720_v28 = vcombine.high %v2028_v53, %v2032_v18  ;;  %v1948_v29 = vld [vmem:[#allocation14 + $0x748] sm:$0xff]  ;;  %v4719_v34 = vcombine.low %v2028_v53, %v2032_v18 }
 0x348   :  { %3819 = vmatpush2.bf16.msra.mxu1 %v4519_v30  ;;  %3847 = vmatprep.subr.bf16.mxu0 %v4568_v31  ;;  %v1952_v30 = vld [vmem:[#allocation14 + $0x768] sm:$0xff] }
 0x349   :  { %3820 = vmatprep.subr.bf16.mxu1 %v4512_v32  ;;  %v2020_v31 = vld [vmem:[#allocation14 + $0x988] sm:$0xff]  ;;  %v4640_v35 = vcombine.high %v1948_v29, %v1952_v30  ;;  %v4639_v39 = vcombine.low %v1948_v29, %v1952_v30 }
 0x34a   :  { %v2024_v32 = vld [vmem:[#allocation14 + $0x9a8] sm:$0xff] }
 0x34b   :  { %3848 = vmatpush1.bf16.msra.mxu0 %v4567_v37  ;;  %v4712_v36 = vcombine.high %v2020_v31, %v2024_v32  ;;  %v1940_v37 = vld [vmem:[#allocation14 + $0x708] sm:$0xff]  ;;  %v4711_v40 = vcombine.low %v2020_v31, %v2024_v32 }
 0x34c   :  { %3821 = vmatpush2.bf16.msra.mxu1 %v4511_v42  ;;  %3849 = vmatprep.subr.bf16.mxu0 %v4560_v43  ;;  %v1944_v42 = vld [vmem:[#allocation14 + $0x728] sm:$0xff] }
 0x34d   :  { %3822 = vmatprep.subr.bf16.mxu1 %v4504_v45  ;;  %v2012_v43 = vld [vmem:[#allocation14 + $0x948] sm:$0xff]  ;;  %v4632_v41 = vcombine.high %v1940_v37, %v1944_v42  ;;  %v4631_v49 = vcombine.low %v1940_v37, %v1944_v42 }
 0x34e   :  { %v2016_v45 = vld [vmem:[#allocation14 + $0x968] sm:$0xff] }
 0x34f   :  { %3850 = vmatpush1.bf16.msra.mxu0 %v4559_v44  ;;  %v4704_v27 = vcombine.high %v2012_v43, %v2016_v45  ;;  %v1932_v44 = vld [vmem:[#allocation14 + $0x6c8] sm:$0xff]  ;;  %v4703_v25 = vcombine.low %v2012_v43, %v2016_v45 }
 0x350   :  { %3823 = vmatpush2.bf16.msra.mxu1 %v4503_v46  ;;  %3851 = vmatprep.subr.bf16.mxu0 %v4552_v47  ;;  %v1936_v46 = vld [vmem:[#allocation14 + $0x6e8] sm:$0xff] }
 0x351   :  { %3824 = vmatprep.subr.bf16.mxu1 %v4496_v48  ;;  %v2004_v47 = vld [vmem:[#allocation14 + $0x908] sm:$0xff]  ;;  %v4624_v50 = vcombine.high %v1932_v44, %v1936_v46  ;;  %v4623_v63 = vcombine.low %v1932_v44, %v1936_v46 }
 0x352   :  { %v2008_v48 = vld [vmem:[#allocation14 + $0x928] sm:$0xff] }
 0x353   :  { %3852 = vmatpush1.bf16.msra.mxu0 %v4551_v54  ;;  %v4696_v51 = vcombine.high %v2004_v47, %v2008_v48  ;;  %v1924_v54 = vld [vmem:[#allocation14 + $0x688] sm:$0xff]  ;;  %v4695_v59 = vcombine.low %v2004_v47, %v2008_v48 }
 0x354   :  { %3825 = vmatpush2.bf16.msra.mxu1 %v4495_v55  ;;  %3853 = vmatprep.subr.bf16.mxu0 %v4544_v56  ;;  %v1928_v55 = vld [vmem:[#allocation14 + $0x6a8] sm:$0xff] }
 0x355   :  { %3826 = vmatprep.subr.bf16.mxu1 %v4488_v62  ;;  %v1996_v56 = vld [vmem:[#allocation14 + $0x8c8] sm:$0xff]  ;;  %v4616_v1 = vcombine.high %v1924_v54, %v1928_v55  ;;  %v4615_v8 = vcombine.low %v1924_v54, %v1928_v55 }
 0x356   :  { %v2000_v62 = vld [vmem:[#allocation14 + $0x8e8] sm:$0xff] }
 0x357   :  { %3854 = vmatpush1.bf16.msra.mxu0 %v4543_v4  ;;  %v4688_v3 = vcombine.high %v1996_v56, %v2000_v62  ;;  %v1916_v4 = vld [vmem:[#allocation14 + $0x648] sm:$0xff]  ;;  %v4687_v10 = vcombine.low %v1996_v56, %v2000_v62 }
 0x358   :  { %3827 = vmatpush2.bf16.msra.mxu1 %v4487_v5  ;;  %3855 = vmatprep.subr.bf16.mxu0 %v4536_v6  ;;  %v1920_v5 = vld [vmem:[#allocation14 + $0x668] sm:$0xff] }
 0x359   :  { %3828 = vmatprep.subr.bf16.mxu1 %v4480_v7  ;;  %v1988_v6 = vld [vmem:[#allocation14 + $0x888] sm:$0xff]  ;;  %v4608_v11 = vcombine.high %v1916_v4, %v1920_v5  ;;  %v4607_v17 = vcombine.low %v1916_v4, %v1920_v5 }
 0x35a   :  { %v1992_v7 = vld [vmem:[#allocation14 + $0x8a8] sm:$0xff] }
 0x35b   :  { %3856 = vmatpush1.bf16.msra.mxu0 %v4535_v13  ;;  %v4680_v12 = vcombine.high %v1988_v6, %v1992_v7  ;;  %v1908_v13 = vld [vmem:[#allocation14 + $0x608] sm:$0xff]  ;;  %v4679_v52 = vcombine.low %v1988_v6, %v1992_v7 }
 0x35c   :  { %3829 = vmatpush2.bf16.msra.mxu1 %v4479_v14  ;;  %3857 = vmatprep.subr.bf16.mxu0 %v4656_v15  ;;  %v1912_v14 = vld [vmem:[#allocation14 + $0x628] sm:$0xff] }
 0x35d   :  { %3830 = vmatprep.subr.bf16.mxu1 %v4472_v16  ;;  %v1980_v15 = vld [vmem:[#allocation14 + $0x848] sm:$0xff]  ;;  %v4600_v53 = vcombine.high %v1908_v13, %v1912_v14  ;;  %v4599_v29 = vcombine.low %v1908_v13, %v1912_v14 }
 0x35e   :  { %v1984_v16 = vld [vmem:[#allocation14 + $0x868] sm:$0xff] }
 0x35f   :  { %3858 = vmatpush2.bf16.msra.mxu0 %v4655_v21  ;;  %v4672_v18 = vcombine.high %v1980_v15, %v1984_v16  ;;  %v1773_v21 = vld [vmem:[#allocation14 + $0x1d0] sm:$0xff]  ;;  %v4671_v30 = vcombine.low %v1980_v15, %v1984_v16 }
 0x360   :  { %3831 = vmatpush2.bf16.msra.mxu1 %v4471_v24  ;;  %3859 = vmatprep.subr.bf16.mxu0 %v4648_v26  ;;  %v1777_v24 = vld [vmem:[#allocation14 + $0x1f0] sm:$0xff]  ;;  %v1972_v26 = vld [vmem:[#allocation14 + $0x808] sm:$0xff] }
 0x361   :  { %3882 = vmatprep.subr.bf16.mxu1 %v4720_v28  ;;  %v1976_v28 = vld [vmem:[#allocation14 + $0x828] sm:$0xff]  ;;  %v4466_v31 = vcombine.high %v1773_v21, %v1777_v24  ;;  %v4465_v37 = vcombine.low %v1773_v21, %v1777_v24 }
 0x362   :  { %v4664_v32 = vcombine.high %v1972_v26, %v1976_v28  ;;  %v4663_v42 = vcombine.low %v1972_v26, %v1976_v28 }
 0x363   :  { %3833 = vmatmul.mubr.bf16.vlgmr.msra.gmra.mxu1 %v5458_v20  ;;  %3860 = vmatpush2.bf16.msra.mxu0 %v4647_v33  ;;  %v1765_v33 = vld [vmem:[#allocation14 + $0x190] sm:$0xff] }
 0x364   :  { %3883 = vmatpush1.bf16.msra.mxu1 %v4719_v34  ;;  %3861 = vmatprep.subr.bf16.mxu0 %v4640_v35  ;;  %v1769_v34 = vld [vmem:[#allocation14 + $0x1b0] sm:$0xff] }
 0x365   :  { %3884 = vmatprep.subr.bf16.mxu1 %v4712_v36  ;;  %3914 = vmatprep.mubr.bf16.mxu1 %v5310_v0  ;;  %v1901_v35 = vld [vmem:[#allocation14 + $0x5d0] sm:$0xff]  ;;  %v4458_v43 = vcombine.high %v1765_v33, %v1769_v34  ;;  %v4457_v44 = vcombine.low %v1765_v33, %v1769_v34 }
 0x366   :  { %v1905_v36 = vld [vmem:[#allocation14 + $0x5f0] sm:$0xff] }
 0x367   :  { %3862 = vmatpush2.bf16.msra.mxu0 %v4639_v39  ;;  %v4594_v45 = vcombine.high %v1901_v35, %v1905_v36  ;;  %v1757_v39 = vld [vmem:[#allocation14 + $0x150] sm:$0xff]  ;;  %v4593_v46 = vcombine.low %v1901_v35, %v1905_v36 }
 0x368   :  { %3885 = vmatpush1.bf16.msra.mxu1 %v4711_v40  ;;  %3863 = vmatprep.subr.bf16.mxu0 %v4632_v41  ;;  %v1761_v40 = vld [vmem:[#allocation14 + $0x170] sm:$0xff] }
 0x369   :  { %3886 = vmatprep.subr.bf16.mxu1 %v4704_v27  ;;  %v1893_v41 = vld [vmem:[#allocation14 + $0x590] sm:$0xff]  ;;  %v4450_v47 = vcombine.high %v1757_v39, %v1761_v40  ;;  %v4449_v54 = vcombine.low %v1757_v39, %v1761_v40 }
 0x36a   :  { %v1897_v27 = vld [vmem:[#allocation14 + $0x5b0] sm:$0xff] }
 0x36b   :  { %3864 = vmatpush2.bf16.msra.mxu0 %v4631_v49  ;;  %v4586_v48 = vcombine.high %v1893_v41, %v1897_v27  ;;  %v1749_v49 = vld [vmem:[#allocation14 + $0x110] sm:$0xff]  ;;  %v4585_v55 = vcombine.low %v1893_v41, %v1897_v27 }
 0x36c   :  { %3887 = vmatpush1.bf16.msra.mxu1 %v4703_v25  ;;  %3865 = vmatprep.subr.bf16.mxu0 %v4624_v50  ;;  %v1753_v25 = vld [vmem:[#allocation14 + $0x130] sm:$0xff] }
 0x36d   :  { %3888 = vmatprep.subr.bf16.mxu1 %v4696_v51  ;;  %v1885_v50 = vld [vmem:[#allocation14 + $0x550] sm:$0xff]  ;;  %v4442_v56 = vcombine.high %v1749_v49, %v1753_v25  ;;  %v4441_v4 = vcombine.low %v1749_v49, %v1753_v25 }
 0x36e   :  { %v1889_v51 = vld [vmem:[#allocation14 + $0x570] sm:$0xff] }
 0x36f   :  { %3866 = vmatpush2.bf16.msra.mxu0 %v4623_v63  ;;  %v4578_v62 = vcombine.high %v1885_v50, %v1889_v51  ;;  %v1741_v63 = vld [vmem:[#allocation14 + $0xd0] sm:$0xff]  ;;  %v4577_v5 = vcombine.low %v1885_v50, %v1889_v51 }
 0x370   :  { %3889 = vmatpush1.bf16.msra.mxu1 %v4695_v59  ;;  %3867 = vmatprep.subr.bf16.mxu0 %v4616_v1  ;;  %v1745_v59 = vld [vmem:[#allocation14 + $0xf0] sm:$0xff] }
 0x371   :  { %3890 = vmatprep.subr.bf16.mxu1 %v4688_v3  ;;  %v1877_v1 = vld [vmem:[#allocation14 + $0x510] sm:$0xff]  ;;  %v4434_v6 = vcombine.high %v1741_v63, %v1745_v59  ;;  %v4433_v13 = vcombine.low %v1741_v63, %v1745_v59 }
 0x372   :  { %v1881_v3 = vld [vmem:[#allocation14 + $0x530] sm:$0xff] }
 0x373   :  { %3868 = vmatpush2.bf16.msra.mxu0 %v4615_v8  ;;  %v4570_v7 = vcombine.high %v1877_v1, %v1881_v3  ;;  %v1733_v8 = vld [vmem:[#allocation14 + $0x90] sm:$0xff]  ;;  %v4569_v14 = vcombine.low %v1877_v1, %v1881_v3 }
 0x374   :  { %3891 = vmatpush1.bf16.msra.mxu1 %v4687_v10  ;;  %3869 = vmatprep.subr.bf16.mxu0 %v4608_v11  ;;  %v1737_v10 = vld [vmem:[#allocation14 + $0xb0] sm:$0xff] }
 0x375   :  { %3892 = vmatprep.subr.bf16.mxu1 %v4680_v12  ;;  %v1869_v11 = vld [vmem:[#allocation14 + $0x4d0] sm:$0xff]  ;;  %v4426_v15 = vcombine.high %v1733_v8, %v1737_v10  ;;  %v4425_v21 = vcombine.low %v1733_v8, %v1737_v10 }
 0x376   :  { %v1873_v12 = vld [vmem:[#allocation14 + $0x4f0] sm:$0xff] }
 0x377   :  { %3870 = vmatpush2.bf16.msra.mxu0 %v4607_v17  ;;  %v4562_v16 = vcombine.high %v1869_v11, %v1873_v12  ;;  %v1725_v17 = vld [vmem:[#allocation14 + $0x50] sm:$0xff]  ;;  %v4561_v24 = vcombine.low %v1869_v11, %v1873_v12 }
 0x378   :  { %3893 = vmatpush1.bf16.msra.mxu1 %v4679_v52  ;;  %3871 = vmatprep.subr.bf16.mxu0 %v4600_v53  ;;  %v1729_v52 = vld [vmem:[#allocation14 + $0x70] sm:$0xff] }
 0x379   :  { %3894 = vmatprep.subr.bf16.mxu1 %v4672_v18  ;;  %v1861_v53 = vld [vmem:[#allocation14 + $0x490] sm:$0xff]  ;;  %v4418_v26 = vcombine.high %v1725_v17, %v1729_v52  ;;  %v4417_v33 = vcombine.low %v1725_v17, %v1729_v52 }
 0x37a   :  { %v1865_v18 = vld [vmem:[#allocation14 + $0x4b0] sm:$0xff] }
 0x37b   :  { %3872 = vmatpush2.bf16.msra.mxu0 %v4599_v29  ;;  %v4554_v28 = vcombine.high %v1861_v53, %v1865_v18  ;;  %v1717_v29 = vld [vmem:[#allocation14 + $0x10] sm:$0xff]  ;;  %v4553_v34 = vcombine.low %v1861_v53, %v1865_v18 }
 0x37c   :  { %3895 = vmatpush1.bf16.msra.mxu1 %v4671_v30  ;;  %3923 = vmatprep.subr.bf16.mxu0 %v4466_v31  ;;  %v1721_v30 = vld [vmem:[#allocation14 + $0x30] sm:$0xff] }
 0x37d   :  { %3896 = vmatprep.subr.bf16.mxu1 %v4664_v32  ;;  %v1853_v31 = vld [vmem:[#allocation14 + $0x450] sm:$0xff]  ;;  %v4410_v35 = vcombine.high %v1717_v29, %v1721_v30  ;;  %v4409_v39 = vcombine.low %v1717_v29, %v1721_v30 }
 0x37e   :  { %3874 = vmatmul.mubr.bf16.vlgmr.msra.gmra.mxu0 %v5477_v23  ;;  %v1857_v32 = vld [vmem:[#allocation14 + $0x470] sm:$0xff] }
 0x37f   :  { %3924 = vmatpush1.bf16.msra.mxu0 %v4465_v37  ;;  %3955 = vmatprep.mubr.bf16.mxu0 %v5456_v19  ;;  %v4546_v36 = vcombine.high %v1853_v31, %v1857_v32  ;;  %v1837_v37 = vld [vmem:[#allocation14 + $0x3d0] sm:$0xff]  ;;  %v4545_v40 = vcombine.low %v1853_v31, %v1857_v32 }
 0x380   :  { %3897 = vmatpush1.bf16.msra.mxu1 %v4663_v42  ;;  %3925 = vmatprep.subr.bf16.mxu0 %v4458_v43  ;;  %v1841_v42 = vld [vmem:[#allocation14 + $0x3f0] sm:$0xff] }
 0x381   :  { %3964 = vmatprep.subr.bf16.mxu1 %v4594_v45  ;;  %v1845_v43 = vld [vmem:[#allocation14 + $0x410] sm:$0xff]  ;;  %v4530_v41 = vcombine.high %v1837_v37, %v1841_v42  ;;  %v4529_v49 = vcombine.low %v1837_v37, %v1841_v42 }
 0x382   :  { %v1849_v45 = vld [vmem:[#allocation14 + $0x430] sm:$0xff] }
 0x383   :  { %3915 = vmatmul.mubr.bf16.vlgmr.msra.gmra.mxu1 %v5491_v9  ;;  %3926 = vmatpush1.bf16.msra.mxu0 %v4457_v44  ;;  %v4538_v27 = vcombine.high %v1845_v43, %v1849_v45  ;;  %v1829_v44 = vld [vmem:[#allocation14 + $0x390] sm:$0xff]  ;;  %v4537_v25 = vcombine.low %v1845_v43, %v1849_v45 }
 0x384   :  { %3965 = vmatpush1.bf16.msra.mxu1 %v4593_v46  ;;  %3996 = vmatprep.mubr.bf16.mxu1 %v5475_v22  ;;  %v1833_v46 = vld [vmem:[#allocation14 + $0x3b0] sm:$0xff] }
 0x385   :  { %3927 = vmatprep.subr.bf16.mxu0 %v4450_v47  ;;  %3966 = vmatprep.subr.bf16.mxu1 %v4586_v48  ;;  %v1965_v47 = vld [vmem:[#allocation14 + $0x7d0] sm:$0xff]  ;;  %v4522_v50 = vcombine.high %v1829_v44, %v1833_v46  ;;  %v4521_v63 = vcombine.low %v1829_v44, %v1833_v46 }
 0x386   :  { %v1969_v48 = vld [vmem:[#allocation14 + $0x7f0] sm:$0xff] }
 0x387   :  { %3928 = vmatpush1.bf16.msra.mxu0 %v4449_v54  ;;  %v4658_v51 = vcombine.high %v1965_v47, %v1969_v48  ;;  %v1821_v54 = vld [vmem:[#allocation14 + $0x350] sm:$0xff]  ;;  %v4657_v59 = vcombine.low %v1965_v47, %v1969_v48 }
 0x388   :  { %3967 = vmatpush1.bf16.msra.mxu1 %v4585_v55  ;;  %3929 = vmatprep.subr.bf16.mxu0 %v4442_v56  ;;  %v1825_v55 = vld [vmem:[#allocation14 + $0x370] sm:$0xff] }
 0x389   :  { %3968 = vmatprep.subr.bf16.mxu1 %v4578_v62  ;;  %v1957_v56 = vld [vmem:[#allocation14 + $0x790] sm:$0xff]  ;;  %v4514_v1 = vcombine.high %v1821_v54, %v1825_v55  ;;  %v4513_v10 = vcombine.low %v1821_v54, %v1825_v55 }
 0x38a   :  { %v1961_v62 = vld [vmem:[#allocation14 + $0x7b0] sm:$0xff] }
 0x38b   :  { %3930 = vmatpush1.bf16.msra.mxu0 %v4441_v4  ;;  %v4650_v3 = vcombine.high %v1957_v56, %v1961_v62  ;;  %v1813_v4 = vld [vmem:[#allocation14 + $0x310] sm:$0xff]  ;;  %v4649_v12 = vcombine.low %v1957_v56, %v1961_v62 }
 0x38c   :  { %3969 = vmatpush1.bf16.msra.mxu1 %v4577_v5  ;;  %3931 = vmatprep.subr.bf16.mxu0 %v4434_v6  ;;  %v1817_v5 = vld [vmem:[#allocation14 + $0x330] sm:$0xff] }
 0x38d   :  { %3970 = vmatprep.subr.bf16.mxu1 %v4570_v7  ;;  %v1949_v7 = vld [vmem:[#allocation14 + $0x750] sm:$0xff]  ;;  %v4505_v18 = vcombine.low %v1813_v4, %v1817_v5 }
 0x38e   :  { %v1953_v8 = vld [vmem:[#allocation14 + $0x770] sm:$0xff] }
 0x38f   :  { %3932 = vmatpush1.bf16.msra.mxu0 %v4433_v13  ;;  %v4506_v13 = vcombine.high %v1813_v4, %v1817_v5  ;;  %v1941_v52 = vld [vmem:[#allocation14 + $0x710] sm:$0xff] }
 0x390   :  { %3971 = vmatpush1.bf16.msra.mxu1 %v4569_v14  ;;  %3933 = vmatprep.subr.bf16.mxu0 %v4426_v15  ;;  %v4642_v14 = vcombine.high %v1949_v7, %v1953_v8  ;;  %v1805_v15 = vld [vmem:[#allocation14 + $0x2d0] sm:$0xff] }
 0x391   :  { %3972 = vmatprep.subr.bf16.mxu1 %v4562_v16  ;;  %v1809_v16 = vld [vmem:[#allocation14 + $0x2f0] sm:$0xff] }
 0x392   :  { %v1945_v53 = vld [vmem:[#allocation14 + $0x730] sm:$0xff] }
 0x393   :  { %3934 = vmatpush1.bf16.msra.mxu0 %v4425_v21  ;;  %v1797_v29 = vld [vmem:[#allocation14 + $0x290] sm:$0xff] }
 0x394   :  { %3973 = vmatpush1.bf16.msra.mxu1 %v4561_v24  ;;  %3935 = vmatprep.subr.bf16.mxu0 %v4418_v26  ;;  %v4641_v24 = vcombine.low %v1949_v7, %v1953_v8  ;;  %v4498_v26 = vcombine.high %v1805_v15, %v1809_v16  ;;  %v1801_v30 = vld [vmem:[#allocation14 + $0x2b0] sm:$0xff]  ;;  %v1774_v7 = vld [vmem:[#allocation14 + $0x1d8] sm:$0xff] }
 0x395   :  { %3974 = vmatprep.subr.bf16.mxu1 %v4554_v28  ;;  %v4634_v28 = vcombine.high %v1941_v52, %v1945_v53  ;;  %v1933_v31 = vld [vmem:[#allocation14 + $0x6d0] sm:$0xff]  ;;  %v1778_v8 = vld [vmem:[#allocation14 + $0x1f8] sm:$0xff] }
 0x396   :  { %v1937_v32 = vld [vmem:[#allocation14 + $0x6f0] sm:$0xff] }
 0x397   :  { %3936 = vmatpush1.bf16.msra.mxu0 %v4417_v33  ;;  %v4497_v33 = vcombine.low %v1805_v15, %v1809_v16  ;;  %v1789_v37 = vld [vmem:[#allocation14 + $0x250] sm:$0xff] }
 0x398   :  { %3975 = vmatpush1.bf16.msra.mxu1 %v4553_v34  ;;  %3937 = vmatprep.subr.bf16.mxu0 %v4410_v35  ;;  %v4633_v34 = vcombine.low %v1941_v52, %v1945_v53  ;;  %v4490_v35 = vcombine.high %v1797_v29, %v1801_v30  ;;  %v1793_v42 = vld [vmem:[#allocation14 + $0x270] sm:$0xff]  ;;  %v1770_v52 = vld [vmem:[#allocation14 + $0x1b8] sm:$0xff] }
 0x399   :  { %3976 = vmatprep.subr.bf16.mxu1 %v4546_v36  ;;  %v4626_v36 = vcombine.high %v1933_v31, %v1937_v32  ;;  %v1925_v43 = vld [vmem:[#allocation14 + $0x690] sm:$0xff] }
 0x39a   :  { %v1929_v45 = vld [vmem:[#allocation14 + $0x6b0] sm:$0xff] }
 0x39b   :  { %3938 = vmatpush1.bf16.msra.mxu0 %v4409_v39  ;;  %v4489_v39 = vcombine.low %v1797_v29, %v1801_v30  ;;  %v1781_v44 = vld [vmem:[#allocation14 + $0x210] sm:$0xff]  ;;  %v1758_v29 = vld [vmem:[#allocation14 + $0x158] sm:$0xff] }
 0x39c   :  { %3977 = vmatpush1.bf16.msra.mxu1 %v4545_v40  ;;  %3939 = vmatprep.subr.bf16.mxu0 %v4530_v41  ;;  %v4625_v40 = vcombine.low %v1933_v31, %v1937_v32  ;;  %v4482_v41 = vcombine.high %v1789_v37, %v1793_v42  ;;  %v1785_v46 = vld [vmem:[#allocation14 + $0x230] sm:$0xff]  ;;  %v1762_v30 = vld [vmem:[#allocation14 + $0x178] sm:$0xff] }
 0x39d   :  { %3978 = vmatprep.subr.bf16.mxu1 %v4538_v27  ;;  %v4618_v27 = vcombine.high %v1925_v43, %v1929_v45  ;;  %v1917_v47 = vld [vmem:[#allocation14 + $0x650] sm:$0xff] }
 0x39e   :  { %v1921_v48 = vld [vmem:[#allocation14 + $0x670] sm:$0xff] }
 0x39f   :  { %3940 = vmatpush2.bf16.msra.mxu0 %v4529_v49  ;;  %v4481_v49 = vcombine.low %v1789_v37, %v1793_v42  ;;  %v2029_v54 = vld [vmem:[#allocation14 + $0x9d0] sm:$0xff]  ;;  %v1750_v37 = vld [vmem:[#allocation14 + $0x118] sm:$0xff] }
 0x3a0   :  { %3979 = vmatpush1.bf16.msra.mxu1 %v4537_v25  ;;  %3941 = vmatprep.subr.bf16.mxu0 %v4522_v50  ;;  %v4617_v25 = vcombine.low %v1925_v43, %v1929_v45  ;;  %v4474_v50 = vcombine.high %v1781_v44, %v1785_v46  ;;  %v2033_v55 = vld [vmem:[#allocation14 + $0x9f0] sm:$0xff]  ;;  %v1754_v42 = vld [vmem:[#allocation14 + $0x138] sm:$0xff]  ;;  %v4451_v45 = vcombine.low %v1758_v29, %v1762_v30 }
 0x3a1   :  { %3980 = vmatprep.subr.bf16.mxu1 %v4658_v51  ;;  %v4610_v51 = vcombine.high %v1917_v47, %v1921_v48  ;;  %v1909_v56 = vld [vmem:[#allocation14 + $0x610] sm:$0xff] }
 0x3a2   :  { %v5501_v6 = vpop.f32.mrf.mxu0  ;;  %v1913_v62 = vld [vmem:[#allocation14 + $0x630] sm:$0xff] }
 0x3a3   :  { %3942 = vmatpush2.bf16.msra.mxu0 %v4521_v63  ;;  %v4473_v63 = vcombine.low %v1781_v44, %v1785_v46  ;;  %v2021_v4 = vld [vmem:[#allocation14 + $0x990] sm:$0xff]  ;;  %v1746_v44 = vld [vmem:[#allocation14 + $0xf8] sm:$0xff] }
 0x3a4   :  { %3981 = vmatpush2.bf16.msra.mxu1 %v4657_v59  ;;  %v5503_v11 = vpop.f32.mrf.mxu0  ;;  %3943 = vmatprep.subr.bf16.mxu0 %v4514_v1  ;;  %v4609_v59 = vcombine.low %v1917_v47, %v1921_v48  ;;  %v4722_v1 = vcombine.high %v2029_v54, %v2033_v55  ;;  %v2025_v5 = vld [vmem:[#allocation14 + $0x9b0] sm:$0xff]  ;;  %v4443_v47 = vcombine.low %v1750_v37, %v1754_v42 }
 0x3a5   :  { %3982 = vmatprep.subr.bf16.mxu1 %v4650_v3  ;;  %v4602_v3 = vcombine.high %v1909_v56, %v1913_v62  ;;  %v2013_v15 = vld [vmem:[#allocation14 + $0x950] sm:$0xff]  ;;  %v4713_v53 = vcombine.low %v2021_v4, %v2025_v5 }
 0x3a6   :  { %v3715_v17 = vpop.f32.mrf.mxu0  ;;  %v2017_v16 = vld [vmem:[#allocation14 + $0x970] sm:$0xff] }
 0x3a7   :  { %3944 = vmatpush2.bf16.msra.mxu0 %v4513_v10  ;;  %v4721_v10 = vcombine.low %v2029_v54, %v2033_v55  ;;  %v1766_v17 = vld [vmem:[#allocation14 + $0x198] sm:$0xff]  ;;  %v4705_v31 = vcombine.low %v2013_v15, %v2017_v16 }
 0x3a8   :  { %3983 = vmatpush2.bf16.msra.mxu1 %v4649_v12  ;;  %v3716_v21 = vpop.f32.mrf.mxu0  ;;  %3945 = vmatprep.subr.bf16.mxu0 %v4506_v13  ;;  %v4601_v12 = vcombine.low %v1909_v56, %v1913_v62  ;;  %v4714_v13 = vcombine.high %v2021_v4, %v2025_v5  ;;  %v4459_v32 = vcombine.low %v1766_v17, %v1770_v52  ;;  %v1738_v54 = vld [vmem:[#allocation14 + $0xb8] sm:$0xff] }
 0x3a9   :  { %3984 = vmatprep.subr.bf16.mxu1 %v4642_v14  ;;  %v4468_v14 = vcombine.high %v1774_v7, %v1778_v8  ;;  %v4706_v21 = vcombine.high %v2013_v15, %v2017_v16  ;;  %v1730_v4 = vld [vmem:[#allocation14 + $0x78] sm:$0xff] }
 0x3aa   :  { %v1722_v15 = vld [vmem:[#allocation14 + $0x38] sm:$0xff] }
 0x3ab   :  { %3946 = vmatpush2.bf16.msra.mxu0 %v4505_v18  ;;  %v4467_v18 = vcombine.low %v1774_v7, %v1778_v8 }
 0x3ac   :  { %3985 = vmatpush2.bf16.msra.mxu1 %v4641_v24  ;;  %3947 = vmatprep.subr.bf16.mxu0 %v4498_v26  ;;  %v4460_v24 = vcombine.high %v1766_v17, %v1770_v52  ;;  %v2005_v26 = vld [vmem:[#allocation14 + $0x910] sm:$0xff] }
 0x3ad   :  { %3986 = vmatprep.subr.bf16.mxu1 %v4634_v28  ;;  %v2009_v28 = vld [vmem:[#allocation14 + $0x930] sm:$0xff] }
 0x3ae   :  { %v4697_v43 = vcombine.low %v2005_v26, %v2009_v28 }
 0x3af   :  { %3948 = vmatpush2.bf16.msra.mxu0 %v4497_v33  ;;  %v4698_v33 = vcombine.high %v2005_v26, %v2009_v28  ;;  %v1842_v26 = vld [vmem:[#allocation14 + $0x3f8] sm:$0xff] }
 0x3b0   :  { %3987 = vmatpush2.bf16.msra.mxu1 %v4633_v34  ;;  %3949 = vmatprep.subr.bf16.mxu0 %v4490_v35  ;;  %v4452_v34 = vcombine.high %v1758_v29, %v1762_v30  ;;  %v1997_v35 = vld [vmem:[#allocation14 + $0x8d0] sm:$0xff] }
 0x3b1   :  { %3988 = vmatprep.subr.bf16.mxu1 %v4626_v36  ;;  %v2001_v36 = vld [vmem:[#allocation14 + $0x8f0] sm:$0xff] }
 0x3b2   :  { %v4689_v46 = vcombine.low %v1997_v35, %v2001_v36 }
 0x3b3   :  { %3950 = vmatpush2.bf16.msra.mxu0 %v4489_v39  ;;  %v4690_v39 = vcombine.high %v1997_v35, %v2001_v36  ;;  %v1834_v35 = vld [vmem:[#allocation14 + $0x3b8] sm:$0xff] }
 0x3b4   :  { %3989 = vmatpush2.bf16.msra.mxu1 %v4625_v40  ;;  %3951 = vmatprep.subr.bf16.mxu0 %v4482_v41  ;;  %v4444_v40 = vcombine.high %v1750_v37, %v1754_v42  ;;  %v1989_v41 = vld [vmem:[#allocation14 + $0x890] sm:$0xff] }
 0x3b5   :  { %3990 = vmatprep.subr.bf16.mxu1 %v4618_v27  ;;  %v1993_v27 = vld [vmem:[#allocation14 + $0x8b0] sm:$0xff] }
 0x3b6   :  { %v4682_v48 = vcombine.high %v1989_v41, %v1993_v27  ;;  %v4681_v55 = vcombine.low %v1989_v41, %v1993_v27  ;;  %v1826_v41 = vld [vmem:[#allocation14 + $0x378] sm:$0xff] }
 0x3b7   :  { %3952 = vmatpush2.bf16.msra.mxu0 %v4481_v49 }
 0x3b8   :  { %3991 = vmatpush2.bf16.msra.mxu1 %v4617_v25  ;;  %3953 = vmatprep.subr.bf16.mxu0 %v4474_v50  ;;  %v1981_v25 = vld [vmem:[#allocation14 + $0x850] sm:$0xff] }
 0x3b9   :  { %3992 = vmatprep.subr.bf16.mxu1 %v4610_v51  ;;  %v1985_v50 = vld [vmem:[#allocation14 + $0x870] sm:$0xff]  ;;  %v1734_v51 = vld [vmem:[#allocation14 + $0x98] sm:$0xff] }
 0x3ba   :  { %v4674_v62 = vcombine.high %v1981_v25, %v1985_v50  ;;  %v4673_v5 = vcombine.low %v1981_v25, %v1985_v50  ;;  %v4427_v7 = vcombine.low %v1734_v51, %v1738_v54  ;;  %v1814_v25 = vld [vmem:[#allocation14 + $0x318] sm:$0xff] }
 0x3bb   :  { %3954 = vmatpush2.bf16.msra.mxu0 %v4473_v63  ;;  %v4428_v63 = vcombine.high %v1734_v51, %v1738_v54  ;;  %v1818_v50 = vld [vmem:[#allocation14 + $0x338] sm:$0xff] }
 0x3bc   :  { %3993 = vmatpush2.bf16.msra.mxu1 %v4609_v59  ;;  %4005 = vmatprep.subr.bf16.mxu0 %v4722_v1  ;;  %v1973_v59 = vld [vmem:[#allocation14 + $0x810] sm:$0xff] }
 0x3bd   :  { %3994 = vmatprep.subr.bf16.mxu1 %v4602_v3  ;;  %v1977_v1 = vld [vmem:[#allocation14 + $0x830] sm:$0xff]  ;;  %v1726_v3 = vld [vmem:[#allocation14 + $0x58] sm:$0xff] }
 0x3be   :  { %3956 = vmatmul.mubr.bf16.vlgmr.msra.gmra.mxu0 %v5458_v20  ;;  %v4666_v8 = vcombine.high %v1973_v59, %v1977_v1  ;;  %v4665_v16 = vcombine.low %v1973_v59, %v1977_v1  ;;  %v4419_v17 = vcombine.low %v1726_v3, %v1730_v4  ;;  %v1862_v59 = vld [vmem:[#allocation14 + $0x498] sm:$0xff] }
 0x3bf   :  { %4006 = vmatpush1.bf16.msra.mxu0 %v4721_v10  ;;  %4037 = vmatprep.mubr.bf16.mxu0 %v5310_v0  ;;  %v4420_v10 = vcombine.high %v1726_v3, %v1730_v4  ;;  %v1866_v1 = vld [vmem:[#allocation14 + $0x4b8] sm:$0xff] }
 0x3c0   :  { %3995 = vmatpush2.bf16.msra.mxu1 %v4601_v12  ;;  %4007 = vmatprep.subr.bf16.mxu0 %v4714_v13  ;;  %v1902_v12 = vld [vmem:[#allocation14 + $0x5d8] sm:$0xff] }
 0x3c1   :  { %4046 = vmatprep.subr.bf16.mxu1 %v4468_v14  ;;  %v1906_v13 = vld [vmem:[#allocation14 + $0x5f8] sm:$0xff] }
 0x3c2   :  { %v1718_v14 = vld [vmem:[#allocation14 + $0x18] sm:$0xff]  ;;  %v4596_v52 = vcombine.high %v1902_v12, %v1906_v13  ;;  %v4595_v28 = vcombine.low %v1902_v12, %v1906_v13 }
 0x3c3   :  { %3997 = vmatmul.mubr.bf16.vlgmr.msra.gmra.mxu1 %v5477_v23  ;;  %4008 = vmatpush1.bf16.msra.mxu0 %v4713_v53  ;;  %v4412_v53 = vcombine.high %v1718_v14, %v1722_v15  ;;  %v4411_v29 = vcombine.low %v1718_v14, %v1722_v15  ;;  %v1806_v3 = vld [vmem:[#allocation14 + $0x2d8] sm:$0xff] }
 0x3c4   :  { %4047 = vmatpush1.bf16.msra.mxu1 %v4467_v18  ;;  %4078 = vmatprep.mubr.bf16.mxu1 %v5456_v19  ;;  %v1742_v19 = vld [vmem:[#allocation14 + $0xd8] sm:$0xff] }
 0x3c5   :  { %4009 = vmatprep.subr.bf16.mxu0 %v4706_v21  ;;  %4048 = vmatprep.subr.bf16.mxu1 %v4460_v24  ;;  %v4436_v49 = vcombine.high %v1742_v19, %v1746_v44  ;;  %v4435_v56 = vcombine.low %v1742_v19, %v1746_v44  ;;  %v1894_v18 = vld [vmem:[#allocation14 + $0x598] sm:$0xff] }
 0x3c6   :  { %v1898_v21 = vld [vmem:[#allocation14 + $0x5b8] sm:$0xff] }
 0x3c7   :  { %4010 = vmatpush1.bf16.msra.mxu0 %v4705_v31  ;;  %v1838_v24 = vld [vmem:[#allocation14 + $0x3d8] sm:$0xff]  ;;  %v4588_v30 = vcombine.high %v1894_v18, %v1898_v21  ;;  %v4587_v36 = vcombine.low %v1894_v18, %v1898_v21 }
 0x3c8   :  { %4049 = vmatpush1.bf16.msra.mxu1 %v4459_v32  ;;  %4011 = vmatprep.subr.bf16.mxu0 %v4698_v33  ;;  %v4532_v31 = vcombine.high %v1838_v24, %v1842_v26  ;;  %v1886_v32 = vld [vmem:[#allocation14 + $0x558] sm:$0xff]  ;;  %v4531_v37 = vcombine.low %v1838_v24, %v1842_v26 }
 0x3c9   :  { %4050 = vmatprep.subr.bf16.mxu1 %v4452_v34  ;;  %v1890_v33 = vld [vmem:[#allocation14 + $0x578] sm:$0xff] }
 0x3ca   :  { %v1830_v34 = vld [vmem:[#allocation14 + $0x398] sm:$0xff]  ;;  %v4580_v42 = vcombine.high %v1886_v32, %v1890_v33  ;;  %v4579_v19 = vcombine.low %v1886_v32, %v1890_v33 }
 0x3cb   :  { %4012 = vmatpush1.bf16.msra.mxu0 %v4697_v43  ;;  %v4524_v43 = vcombine.high %v1830_v34, %v1834_v35  ;;  %v4523_v44 = vcombine.low %v1830_v34, %v1834_v35  ;;  %v1810_v4 = vld [vmem:[#allocation14 + $0x2f8] sm:$0xff] }
 0x3cc   :  { %4051 = vmatpush1.bf16.msra.mxu1 %v4451_v45  ;;  %4013 = vmatprep.subr.bf16.mxu0 %v4690_v39  ;;  %v1878_v45 = vld [vmem:[#allocation14 + $0x518] sm:$0xff] }
 0x3cd   :  { %4052 = vmatprep.subr.bf16.mxu1 %v4444_v40  ;;  %v1882_v39 = vld [vmem:[#allocation14 + $0x538] sm:$0xff] }
 0x3ce   :  { %v1822_v40 = vld [vmem:[#allocation14 + $0x358] sm:$0xff]  ;;  %v4571_v54 = vcombine.low %v1878_v45, %v1882_v39 }
 0x3cf   :  { %4014 = vmatpush1.bf16.msra.mxu0 %v4689_v46  ;;  %v4572_v46 = vcombine.high %v1878_v45, %v1882_v39  ;;  %v1854_v12 = vld [vmem:[#allocation14 + $0x458] sm:$0xff] }
 0x3d0   :  { %4053 = vmatpush1.bf16.msra.mxu1 %v4443_v47  ;;  %4015 = vmatprep.subr.bf16.mxu0 %v4682_v48  ;;  %v4516_v47 = vcombine.high %v1822_v40, %v1826_v41  ;;  %v1870_v48 = vld [vmem:[#allocation14 + $0x4d8] sm:$0xff] }
 0x3d1   :  { %4054 = vmatprep.subr.bf16.mxu1 %v4436_v49  ;;  %v1874_v49 = vld [vmem:[#allocation14 + $0x4f8] sm:$0xff] }
 0x3d2   :  { %v1858_v13 = vld [vmem:[#allocation14 + $0x478] sm:$0xff] }
 0x3d3   :  { %4016 = vmatpush1.bf16.msra.mxu0 %v4681_v55  ;;  %v4515_v55 = vcombine.low %v1822_v40, %v1826_v41  ;;  %v1798_v14 = vld [vmem:[#allocation14 + $0x298] sm:$0xff] }
 0x3d4   :  { %4055 = vmatpush1.bf16.msra.mxu1 %v4435_v56  ;;  %4017 = vmatprep.subr.bf16.mxu0 %v4674_v62  ;;  %v4564_v56 = vcombine.high %v1870_v48, %v1874_v49  ;;  %v1802_v15 = vld [vmem:[#allocation14 + $0x2b8] sm:$0xff] }
 0x3d5   :  { %4056 = vmatprep.subr.bf16.mxu1 %v4428_v63  ;;  %v4508_v63 = vcombine.high %v1814_v25, %v1818_v50  ;;  %v1846_v18 = vld [vmem:[#allocation14 + $0x418] sm:$0xff] }
 0x3d6   :  { %v1850_v21 = vld [vmem:[#allocation14 + $0x438] sm:$0xff] }
 0x3d7   :  { %4018 = vmatpush1.bf16.msra.mxu0 %v4673_v5  ;;  %v4563_v5 = vcombine.low %v1870_v48, %v1874_v49  ;;  %v1790_v24 = vld [vmem:[#allocation14 + $0x258] sm:$0xff] }
 0x3d8   :  { %4057 = vmatpush1.bf16.msra.mxu1 %v4427_v7  ;;  %4019 = vmatprep.subr.bf16.mxu0 %v4666_v8  ;;  %v4507_v7 = vcombine.low %v1814_v25, %v1818_v50  ;;  %v4556_v8 = vcombine.high %v1862_v59, %v1866_v1  ;;  %v1794_v26 = vld [vmem:[#allocation14 + $0x278] sm:$0xff] }
 0x3d9   :  { %4058 = vmatprep.subr.bf16.mxu1 %v4420_v10  ;;  %v4500_v10 = vcombine.high %v1806_v3, %v1810_v4  ;;  %v4484_v32 = vcombine.high %v1790_v24, %v1794_v26  ;;  %v1966_v33 = vld [vmem:[#allocation14 + $0x7d8] sm:$0xff] }
 0x3da   :  { %v1970_v34 = vld [vmem:[#allocation14 + $0x7f8] sm:$0xff] }
 0x3db   :  { %4020 = vmatpush1.bf16.msra.mxu0 %v4665_v16  ;;  %v4555_v16 = vcombine.low %v1862_v59, %v1866_v1  ;;  %v1782_v35 = vld [vmem:[#allocation14 + $0x218] sm:$0xff]  ;;  %v4660_v45 = vcombine.high %v1966_v33, %v1970_v34  ;;  %v4659_v48 = vcombine.low %v1966_v33, %v1970_v34 }
 0x3dc   :  { %4059 = vmatpush1.bf16.msra.mxu1 %v4419_v17  ;;  %4087 = vmatprep.subr.bf16.mxu0 %v4596_v52  ;;  %v4499_v17 = vcombine.low %v1806_v3, %v1810_v4  ;;  %v4548_v52 = vcombine.high %v1854_v12, %v1858_v13  ;;  %v1958_v41 = vld [vmem:[#allocation14 + $0x798] sm:$0xff] }
 0x3dd   :  { %4060 = vmatprep.subr.bf16.mxu1 %v4412_v53  ;;  %v4492_v53 = vcombine.high %v1798_v14, %v1802_v15 }
 0x3de   :  { %4038 = vmatmul.mubr.bf16.vlgmr.msra.gmra.mxu0 %v5491_v9 }
 0x3df   :  { %4088 = vmatpush1.bf16.msra.mxu0 %v4595_v28  ;;  %4119 = vmatprep.mubr.bf16.mxu0 %v5475_v22  ;;  %v4547_v28 = vcombine.low %v1854_v12, %v1858_v13  ;;  %v2018_v12 = vld [vmem:[#allocation14 + $0x978] sm:$0xff] }
 0x3e0   :  { %4061 = vmatpush1.bf16.msra.mxu1 %v4411_v29  ;;  %4089 = vmatprep.subr.bf16.mxu0 %v4588_v30  ;;  %v5515_v29 = vld [vmem:[#allocation16] sm:$0xff]  ;;  %v4491_v30 = vcombine.low %v1798_v14, %v1802_v15 }
 0x3e1   :  { %4062 = vmatprep.subr.bf16.mxu1 %v4532_v31  ;;  %v4540_v31 = vcombine.high %v1846_v18, %v1850_v21  ;;  %v2044_v39 = vrot.slane %v5515_v29, %v5398_v60 }
 0x3e3   :  { %4090 = vmatpush1.bf16.msra.mxu0 %v4587_v36  ;;  %v5511_v27 = vpop.f32.mrf.mxu1  ;;  %v1786_v36 = vld [vmem:[#allocation14 + $0x238] sm:$0xff]  ;;  %v3714_v25 = vadd.f32 %v5503_v11, %v2044_v39 }
 0x3e4   :  { %4063 = vmatpush2.bf16.msra.mxu1 %v4531_v37  ;;  %4091 = vmatprep.subr.bf16.mxu0 %v4580_v42  ;;  %v2040_v37 = vrot.slane %v5515_v29, %v5395_v58  ;;  %v4539_v42 = vcombine.low %v1846_v18, %v1850_v21  ;;  %v4476_v40 = vcombine.high %v1782_v35, %v1786_v36  ;;  %v2010_v18 = vld [vmem:[#allocation14 + $0x938] sm:$0xff] }
 0x3e5   :  { %v5513_v22 = vpop.f32.mrf.mxu1  ;;  %4064 = vmatprep.subr.bf16.mxu1 %v4524_v43  ;;  %v4483_v43 = vcombine.low %v1790_v24, %v1794_v26  ;;  %v4475_v58 = vcombine.low %v1782_v35, %v1786_v36  ;;  %v1918_v36 = vld [vmem:[#allocation14 + $0x658] sm:$0xff] }
 0x3e7   :  { %4092 = vmatpush1.bf16.msra.mxu0 %v4579_v19  ;;  %v3756_v51 = vpop.f32.mrf.mxu1  ;;  %v1962_v19 = vld [vmem:[#allocation14 + $0x7b8] sm:$0xff] }
 0x3e8   :  { %4065 = vmatpush2.bf16.msra.mxu1 %v4523_v44  ;;  %4093 = vmatprep.subr.bf16.mxu0 %v4572_v46  ;;  %v2030_v44 = vld [vmem:[#allocation14 + $0x9d8] sm:$0xff]  ;;  %v4652_v49 = vcombine.high %v1958_v41, %v1962_v19  ;;  %v4651_v59 = vcombine.low %v1958_v41, %v1962_v19 }
 0x3e9   :  { %v3757_v62 = vpop.f32.mrf.mxu1  ;;  %4066 = vmatprep.subr.bf16.mxu1 %v4516_v47  ;;  %v2034_v46 = vld [vmem:[#allocation14 + $0x9f8] sm:$0xff]  ;;  %v3712_v47 = vadd.f32 %v5501_v6, %v2040_v37 }
 0x3ea   :  { %v4724_v60 = vcombine.high %v2030_v44, %v2034_v46  ;;  %v1950_v51 = vld [vmem:[#allocation14 + $0x758] sm:$0xff]  ;;  %v4723_v3 = vcombine.low %v2030_v44, %v2034_v46 }
 0x3eb   :  { %4094 = vmatpush1.bf16.msra.mxu0 %v4571_v54  ;;  %v3753_v50 = vadd.f32 %v5511_v27, %v3712_v47  ;;  %v1954_v54 = vld [vmem:[#allocation14 + $0x778] sm:$0xff] }
 0x3ec   :  { %4067 = vmatpush2.bf16.msra.mxu1 %v4515_v55  ;;  %4095 = vmatprep.subr.bf16.mxu0 %v4564_v56  ;;  %v2022_v56 = vld [vmem:[#allocation14 + $0x998] sm:$0xff]  ;;  %v4644_v4 = vcombine.high %v1950_v51, %v1954_v54 }
 0x3ed   :  { %4068 = vmatprep.subr.bf16.mxu1 %v4508_v63  ;;  %v2026_v62 = vld [vmem:[#allocation14 + $0x9b8] sm:$0xff]  ;;  %v3755_v63 = vadd.f32 %v5513_v22, %v3714_v25  ;;  %v4643_v22 = vcombine.low %v1950_v51, %v1954_v54 }
 0x3ee   :  { %v4716_v27 = vcombine.high %v2022_v56, %v2026_v62  ;;  %v4715_v14 = vcombine.low %v2022_v56, %v2026_v62  ;;  %v1922_v37 = vld [vmem:[#allocation14 + $0x678] sm:$0xff] }
 0x3ef   :  { %4096 = vmatpush1.bf16.msra.mxu0 %v4563_v5  ;;  %v1942_v5 = vld [vmem:[#allocation14 + $0x718] sm:$0xff]  ;;  %v4612_v19 = vcombine.high %v1918_v36, %v1922_v37  ;;  %v4611_v25 = vcombine.low %v1918_v36, %v1922_v37 }
 0x3f0   :  { %4069 = vmatpush2.bf16.msra.mxu1 %v4507_v7  ;;  %4097 = vmatprep.subr.bf16.mxu0 %v4556_v8  ;;  %v1946_v7 = vld [vmem:[#allocation14 + $0x738] sm:$0xff] }
 0x3f1   :  { %4070 = vmatprep.subr.bf16.mxu1 %v4500_v10  ;;  %v2014_v10 = vld [vmem:[#allocation14 + $0x958] sm:$0xff]  ;;  %v4636_v15 = vcombine.high %v1942_v5, %v1946_v7  ;;  %v4635_v21 = vcombine.low %v1942_v5, %v1946_v7 }
 0x3f2   :  { %v1910_v46 = vld [vmem:[#allocation14 + $0x618] sm:$0xff] }
 0x3f3   :  { %4098 = vmatpush1.bf16.msra.mxu0 %v4555_v16  ;;  %v4708_v16 = vcombine.high %v2014_v10, %v2018_v12  ;;  %v1914_v47 = vld [vmem:[#allocation14 + $0x638] sm:$0xff] }
 0x3f4   :  { %4071 = vmatpush2.bf16.msra.mxu1 %v4499_v17  ;;  %4099 = vmatprep.subr.bf16.mxu0 %v4548_v52  ;;  %v1934_v17 = vld [vmem:[#allocation14 + $0x6d8] sm:$0xff]  ;;  %v4603_v56 = vcombine.low %v1910_v46, %v1914_v47 }
 0x3f5   :  { %4072 = vmatprep.subr.bf16.mxu1 %v4492_v53  ;;  %v1938_v52 = vld [vmem:[#allocation14 + $0x6f8] sm:$0xff] }
 0x3f6   :  { %v2006_v53 = vld [vmem:[#allocation14 + $0x918] sm:$0xff]  ;;  %v4628_v24 = vcombine.high %v1934_v17, %v1938_v52  ;;  %v4627_v33 = vcombine.low %v1934_v17, %v1938_v52 }
 0x3f7   :  { %4100 = vmatpush1.bf16.msra.mxu0 %v4547_v28  ;;  %v4700_v26 = vcombine.high %v2006_v53, %v2010_v18  ;;  %v1926_v28 = vld [vmem:[#allocation14 + $0x698] sm:$0xff]  ;;  %v4699_v34 = vcombine.low %v2006_v53, %v2010_v18 }
 0x3f8   :  { %4073 = vmatpush2.bf16.msra.mxu1 %v4491_v30  ;;  %4101 = vmatprep.subr.bf16.mxu0 %v4540_v31  ;;  %v1930_v30 = vld [vmem:[#allocation14 + $0x6b8] sm:$0xff] }
 0x3f9   :  { %4074 = vmatprep.subr.bf16.mxu1 %v4484_v32  ;;  %v1998_v31 = vld [vmem:[#allocation14 + $0x8d8] sm:$0xff]  ;;  %v4619_v39 = vcombine.low %v1926_v28, %v1930_v30 }
 0x3fa   :  { %v2002_v32 = vld [vmem:[#allocation14 + $0x8f8] sm:$0xff] }
 0x3fb   :  { %4102 = vmatpush1.bf16.msra.mxu0 %v4539_v42  ;;  %v4692_v35 = vcombine.high %v1998_v31, %v2002_v32  ;;  %v1990_v42 = vld [vmem:[#allocation14 + $0x898] sm:$0xff]  ;;  %v4691_v41 = vcombine.low %v1998_v31, %v2002_v32  ;;  %v2059_v32 = vsub.s32 5, %v5392_v57 }
 0x3fc   :  { %4075 = vmatpush2.bf16.msra.mxu1 %v4483_v43  ;;  %4103 = vmatprep.subr.bf16.mxu0 %v4660_v45  ;;  %v1994_v43 = vld [vmem:[#allocation14 + $0x8b8] sm:$0xff] }
 0x3fd   :  { %4076 = vmatprep.subr.bf16.mxu1 %v4476_v40  ;;  %v4684_v44 = vcombine.high %v1990_v42, %v1994_v43  ;;  %v1974_v54 = vld [vmem:[#allocation14 + $0x818] sm:$0xff] }
 0x3fe   :  { %v3793_v55 = vpop.f32.mrf.mxu0 }
 0x3ff   :  { %v3794_v6 = vadd.f32 %v3793_v55, %v3753_v50  ;;  %4104 = vmatpush2.bf16.msra.mxu0 %v4659_v48  ;;  %v4683_v50 = vcombine.low %v1990_v42, %v1994_v43  ;;  %v1978_v55 = vld [vmem:[#allocation14 + $0x838] sm:$0xff] }
 0x400   :  { %4077 = vmatpush2.bf16.msra.mxu1 %v4475_v58  ;;  %v3795_v1 = vpop.f32.mrf.mxu0  ;;  %4105 = vmatprep.subr.bf16.mxu0 %v4652_v49  ;;  %v1982_v58 = vld [vmem:[#allocation14 + $0x858] sm:$0xff] }
 0x401   :  { %v3796_v11 = vadd.f32 %v3795_v1, %v3755_v63  ;;  %4128 = vmatprep.subr.bf16.mxu1 %v4724_v60  ;;  %5065 = vtanh.f32 %v3794_v6  ;;  %v1986_v49 = vld [vmem:[#allocation14 + $0x878] sm:$0xff]  ;;  %v4604_v60 = vcombine.high %v1910_v46, %v1914_v47  ;;  %v4668_v63 = vcombine.high %v1974_v54, %v1978_v55 }
 0x402   :  { %v3797_v8 = vpop.f32.mrf.mxu0  ;;  %v4676_v51 = vcombine.high %v1982_v58, %v1986_v49  ;;  %v4675_v62 = vcombine.low %v1982_v58, %v1986_v49  ;;  %v4667_v6 = vcombine.low %v1974_v54, %v1978_v55  ;;  %v2063_v49 = vsub.s32 6, %v5392_v57 }
 0x403   :  { %5067 = vtanh.f32 %v3796_v11  ;;  %4079 = vmatmul.mubr.bf16.vlgmr.msra.gmra.mxu1 %v5458_v20  ;;  %4106 = vmatpush2.bf16.msra.mxu0 %v4651_v59  ;;  %v4707_v20 = vcombine.low %v2014_v10, %v2018_v12  ;;  %v2048_v11 = vrot.slane %v5515_v29, %v5405_v2 }
 0x404   :  { %4129 = vmatpush1.bf16.msra.mxu1 %v4723_v3  ;;  %v3798_v13 = vpop.f32.mrf.mxu0  ;;  %4107 = vmatprep.subr.bf16.mxu0 %v4644_v4 }
 0x405   :  { %4130 = vmatprep.subr.bf16.mxu1 %v4716_v27  ;;  %4160 = vmatprep.mubr.bf16.mxu1 %v5310_v0  ;;  %v4620_v0 = vcombine.high %v1926_v28, %v1930_v30  ;;  %v2052_v27 = vrot.slane %v5515_v29, %v821_v61 }
 0x407   :  { %4108 = vmatpush2.bf16.msra.mxu0 %v4643_v22 }
 0x408   :  { %4131 = vmatpush1.bf16.msra.mxu1 %v4715_v14  ;;  %4109 = vmatprep.subr.bf16.mxu0 %v4636_v15 }
 0x409   :  { %4132 = vmatprep.subr.bf16.mxu1 %v4708_v16 }
 0x40b   :  { %4110 = vmatpush2.bf16.msra.mxu0 %v4635_v21 }
 0x40c   :  { %4133 = vmatpush1.bf16.msra.mxu1 %v4707_v20  ;;  %4111 = vmatprep.subr.bf16.mxu0 %v4628_v24 }
 0x40d   :  { %4134 = vmatprep.subr.bf16.mxu1 %v4700_v26 }
 0x40e   :  { %v5066_v45 = vpop.eup %5065 }
 0x40f   :  { %4112 = vmatpush2.bf16.msra.mxu0 %v4627_v33  ;;  %v2056_v33 = vrot.slane %v5515_v29, %v825_v38 }
 0x410   :  { %v5068_v40 = vpop.eup %5067  ;;  %4135 = vmatpush1.bf16.msra.mxu1 %v4699_v34  ;;  %4113 = vmatprep.subr.bf16.mxu0 %v4620_v0  ;;  %v2060_v34 = vrot.slane %v5515_v29, %v2059_v32 }
 0x411   :  { %4136 = vmatprep.subr.bf16.mxu1 %v4692_v35  ;;  %v4729_v48 = vpack.c.bf16 %v5068_v40, %v5066_v45 }
 0x413   :  { %4114 = vmatpush2.bf16.msra.mxu0 %v4619_v39  ;;  %4209 = vst [vmem:[#allocation17] sm:$0xff] %v4729_v48 }
 0x414   :  { %4137 = vmatpush1.bf16.msra.mxu1 %v4691_v41  ;;  %4115 = vmatprep.subr.bf16.mxu0 %v4612_v19 }
 0x415   :  { %4138 = vmatprep.subr.bf16.mxu1 %v4684_v44 }
 0x417   :  { %4116 = vmatpush2.bf16.msra.mxu0 %v4611_v25  ;;  %v2067_v25 = vsub.s32 7, %v5392_v57 }
 0x418   :  { %4139 = vmatpush1.bf16.msra.mxu1 %v4683_v50  ;;  %4117 = vmatprep.subr.bf16.mxu0 %v4604_v60  ;;  %v2064_v50 = vrot.slane %v5515_v29, %v2063_v49 }
 0x419   :  { %4140 = vmatprep.subr.bf16.mxu1 %v4676_v51  ;;  %v2068_v60 = vrot.slane %v5515_v29, %v2067_v25 }
 0x41b   :  { %4118 = vmatpush2.bf16.msra.mxu0 %v4603_v56 }
 0x41c   :  { %4141 = vmatpush1.bf16.msra.mxu1 %v4675_v62 }
 0x41d   :  { %4142 = vmatprep.subr.bf16.mxu1 %v4668_v63 }
 0x41e   :  { %4120 = vmatmul.mubr.bf16.vlgmr.msra.gmra.mxu0 %v5477_v23 }
 0x420   :  { %4143 = vmatpush1.bf16.msra.mxu1 %v4667_v6 }
 0x423   :  { %v3834_v59 = vpop.f32.mrf.mxu1  ;;  %4161 = vmatmul.mubr.bf16.vlgmr.msra.gmra.mxu1 %v5491_v9 }
 0x424   :  { %v3835_v7 = vadd.f32 %v3834_v59, %v2048_v11 }
 0x425   :  { %v3836_v1 = vpop.f32.mrf.mxu1 }
 0x426   :  { %v3837_v10 = vadd.f32 %v3836_v1, %v2052_v27 }
 0x427   :  { %v3838_v3 = vpop.f32.mrf.mxu1 }
 0x429   :  { %v3839_v4 = vpop.f32.mrf.mxu1 }
 0x43e   :  { %v3875_v5 = vpop.f32.mrf.mxu0 }
 0x43f   :  { %v3876_v12 = vadd.f32 %v3875_v5, %v3835_v7 }
 0x440   :  { %v3877_v8 = vpop.f32.mrf.mxu0 }
 0x441   :  { %v3878_v13 = vadd.f32 %v3877_v8, %v3837_v10 }
 0x442   :  { %v3879_v23 = vpop.f32.mrf.mxu0 }
 0x443   :  { %v3916_v22 = vpop.f32.mrf.mxu1 }
 0x444   :  { %v3917_v14 = vadd.f32 %v3916_v22, %v3876_v12  ;;  %v3880_v9 = vpop.f32.mrf.mxu0 }
 0x445   :  { %v3918_v15 = vpop.f32.mrf.mxu1 }
 0x446   :  { %v3919_v16 = vadd.f32 %v3918_v15, %v3878_v13  ;;  %5069 = vtanh.f32 %v3917_v14 }
 0x447   :  { %v3920_v17 = vpop.f32.mrf.mxu1 }
 0x448   :  { %5071 = vtanh.f32 %v3919_v16 }
 0x449   :  { %v3921_v2 = vpop.f32.mrf.mxu1 }
 0x453   :  { %v5070_v52 = vpop.eup %5069 }
 0x455   :  { %v5072_v53 = vpop.eup %5071 }
 0x456   :  { %v4730_v18 = vpack.c.bf16 %v5072_v53, %v5070_v52 }
 0x458   :  { %4210 = vst [vmem:[#allocation17 + $0x8] sm:$0xff] %v4730_v18 }
 0x47e   :  { %v3957_v61 = vpop.f32.mrf.mxu0 }
 0x47f   :  { %v3958_v0 = vadd.f32 %v3957_v61, %v2056_v33 }
 0x480   :  { %v3959_v21 = vpop.f32.mrf.mxu0 }
 0x481   :  { %v3960_v35 = vadd.f32 %v3959_v21, %v2060_v34 }
 0x482   :  { %v3961_v20 = vpop.f32.mrf.mxu0 }
 0x483   :  { %v3998_v24 = vpop.f32.mrf.mxu1 }
 0x484   :  { %v3962_v26 = vpop.f32.mrf.mxu0  ;;  %v3999_v36 = vadd.f32 %v3998_v24, %v3958_v0 }
 0x485   :  { %v4000_v28 = vpop.f32.mrf.mxu1 }
 0x486   :  { %v4001_v42 = vadd.f32 %v4000_v28, %v3960_v35 }
 0x487   :  { %v4002_v30 = vpop.f32.mrf.mxu1 }
 0x489   :  { %v4003_v31 = vpop.f32.mrf.mxu1 }
 0x49e   :  { %v4039_v37 = vpop.f32.mrf.mxu0 }
 0x49f   :  { %v4040_v43 = vadd.f32 %v4039_v37, %v3999_v36 }
 0x4a0   :  { %v4041_v45 = vpop.f32.mrf.mxu0 }
 0x4a1   :  { %v4042_v39 = vadd.f32 %v4041_v45, %v4001_v42  ;;  %5073 = vtanh.f32 %v4040_v43 }
 0x4a2   :  { %v4043_v40 = vpop.f32.mrf.mxu0 }
 0x4a3   :  { %5075 = vtanh.f32 %v4042_v39 }
 0x4a4   :  { %v4044_v41 = vpop.f32.mrf.mxu0 }
 0x4ae   :  { %v5074_v19 = vpop.eup %5073 }
 0x4b0   :  { %v5076_v44 = vpop.eup %5075 }
 0x4b1   :  { %v4731_v46 = vpack.c.bf16 %v5076_v44, %v5074_v19 }
 0x4b3   :  { %4211 = vst [vmem:[#allocation17 + $0x10] sm:$0xff] %v4731_v46 }
 0x4c3   :  { %v4080_v47 = vpop.f32.mrf.mxu1 }
 0x4c4   :  { %v4081_v54 = vadd.f32 %v4080_v47, %v2064_v50 }
 0x4c5   :  { %v4082_v38 = vpop.f32.mrf.mxu1 }
 0x4c6   :  { %v4083_v56 = vadd.f32 %v4082_v38, %v2068_v60 }
 0x4c7   :  { %v4084_v48 = vpop.f32.mrf.mxu1 }
 0x4c9   :  { %v4085_v58 = vpop.f32.mrf.mxu1 }
 0x4de   :  { %v4121_v51 = vpop.f32.mrf.mxu0 }
 0x4df   :  { %v4122_v62 = vadd.f32 %v4121_v51, %v4081_v54 }
 0x4e0   :  { %v4123_v55 = vpop.f32.mrf.mxu0 }
 0x4e1   :  { %v4124_v59 = vadd.f32 %v4123_v55, %v4083_v56 }
 0x4e2   :  { %v4125_v63 = vpop.f32.mrf.mxu0 }
 0x4e3   :  { %v4162_v6 = vpop.f32.mrf.mxu1 }
 0x4e4   :  { %v4163_v1 = vadd.f32 %v4162_v6, %v4122_v62  ;;  %v4126_v3 = vpop.f32.mrf.mxu0 }
 0x4e5   :  { %v4164_v4 = vpop.f32.mrf.mxu1 }
 0x4e6   :  { %v4165_v11 = vadd.f32 %v4164_v4, %v4124_v59  ;;  %5077 = vtanh.f32 %v4163_v1 }
 0x4e7   :  { %v4166_v27 = vpop.f32.mrf.mxu1 }
 0x4e8   :  { %5079 = vtanh.f32 %v4165_v11 }
 0x4e9   :  { %v4167_v57 = vpop.f32.mrf.mxu1 }
 0x4f3   :  { %v5078_v5 = vpop.eup %5077 }
 0x4f5   :  { %v5080_v29 = vpop.eup %5079 }
 0x4f6   :  { %v4732_v7 = vpack.c.bf16 %v5080_v29, %v5078_v5 }
 0x4f8   :  { %4212 = vst [vmem:[#allocation17 + $0x18] sm:$0xff] %v4732_v7 }
 0x4f9   :  { %5272 = shalt.err (!%p5269_p7)
}
 0x4fa   :  { %4222 = dma.vmem_to_hbm [thread:$0]  %s4220_s8, 512, %s5555_s9, [#allocation4]  }
 0x4fb   :  { %5291 = dma.done.wait [#allocation4], 512  }
 0x4fc   :  { %5292 = vsyncadd [#allocation4], 4294966784 }
 0x4fd   :  { %4226 = vsyncpa [#allocation3], 1 }
 0x4fe   :  { %4227 = vsyncpa [#allocation6], 1 }
 0x4ff   :  { %4228 = vsyncpa [#allocation9], 1 }
 0x500   :  { %4229 = vsyncpa [#allocation12], 1 }
 0x501   :  { %4230 = vsyncpa [#allocation15], 1 }
 0x502   :  { %4231 = vsyncpa [#allocation4], 1 }

</bundles_post_ra>
